<compile_context>
chip_gen: v7x
topology: tpu7x:2x2x1
jax: 0.10.0
libtpu: 0.0.40
codegen_flags: <defaults>
</compile_context>

<pallas_src>
import math

import numpy as np
import jax
import jax.numpy as jnp
from jax.experimental import pallas as pl
from jax.experimental.pallas import tpu as pltpu

BATCH_SIZE = 2
EMBEDDING_DIM = 128
NUM_HEADS = 8
HEAD_DIM = EMBEDDING_DIM // NUM_HEADS
NEG = -1000.0          # additive mask value used by the PyTorch module
KILL = -1.0e9          # kills cross-batch blocks introduced by batch fusion


def _softmax_lastdim(x):
    m = jnp.max(x, axis=-1, keepdims=True)
    e = jnp.exp(x - m)
    return e / jnp.sum(e, axis=-1, keepdims=True)


# ----------------------------------------------------------------------------
# Kernel
# ----------------------------------------------------------------------------
def decoder_layer_kernel(
    x_ref, enc_ref, smask_ref, cmask_ref,
    g1_ref, sel1_ref, g2_ref, sel2_ref,
    wqkv1_ref, wo1_ref, b1_ref,
    wq2_ref, wkv2_ref, wo2_ref, b2_ref,
    w3_ref, b3_ref, w4_ref, b4_ref,
    out_ref,
):
    b, s_t, e = x_ref.shape
    s_s = enc_ref.shape[1]
    rows_t = b * s_t

    x = x_ref[...].reshape(rows_t, e)              # f32 (residual path)
    x_bf = x.astype(jnp.bfloat16)
    enc_bf = enc_ref[...].reshape(b * s_s, e)      # bf16 (wrapper cast)

    def attention(q_bf, kv_bf, g_ref, sel_ref, mask_ref):
        """Block-diagonal multi-head attention over both batch elements.

        q_bf : (B*Sq, E)  bf16, head h in lanes [h*HD,(h+1)*HD), scale folded in.
        kv_bf: (B*Sk, 2E) bf16, lanes [K | V] in the same head-contiguous layout.
        g_ref: (B*H*Sk, B*Sk) 0/1 bf16 "replicate rows per head" matrix.
        sel_ref: (B*H*Sk, E) 0/1 bf16 head-lane selection mask (also serves as
                 the denominator-broadcast matrix).
        mask_ref: (B*Sq, B*H*Sk) f32 additive mask (causal / query mask /
                 cross-batch -1e9 kill), pre-broadcast in the wrapper.
        Returns the head-concatenated context, (B*Sq, E) f32.
        """
        sel = sel_ref[...]
        # Replicate K|V rows per head (each output row copies exactly one input
        # row, so the bf16 round-trip is lossless), then zero non-head lanes.
        tiled = jnp.dot(g_ref[...], kv_bf,
                        preferred_element_type=jnp.float32).astype(jnp.bfloat16)
        kbd = tiled[:, :e] * sel                   # (B*H*Sk, E) block-diag K
        vbd = tiled[:, e:] * sel                   # (B*H*Sk, E) block-diag V
        # All-head, all-batch scores in a single MXU op (contract lane dims).
        s = jax.lax.dot_general(q_bf, kbd, (((1,), (1,)), ((), ())),
                                preferred_element_type=jnp.float32)
        s = s + mask_ref[...]
        # One global row max is valid for every head (softmax shift-invariance);
        # cross-batch blocks sit at ~-1e9 and underflow to exactly 0 after exp.
        p = jnp.exp(s - jnp.max(s, axis=-1, keepdims=True)).astype(jnp.bfloat16)
        ctx = jnp.dot(p, vbd, preferred_element_type=jnp.float32)   # un-normalized
        den = jnp.dot(p, sel, preferred_element_type=jnp.float32)   # per-head sums
        return ctx * pl.reciprocal(den, approx=True)

    # ---- masked self-attention + linear_1 + residual ----
    proj1 = jnp.dot(x_bf, wqkv1_ref[...],
                    preferred_element_type=jnp.float32).astype(jnp.bfloat16)
    ctx1 = attention(proj1[:, :e], proj1[:, e:], g1_ref, sel1_ref, smask_ref)
    lin1 = jnp.dot(ctx1.astype(jnp.bfloat16), wo1_ref[...],
                   preferred_element_type=jnp.float32) + b1_ref[...]
    res1 = lin1 + x

    # ---- cross-attention + linear_2 + residual ----
    q2 = jnp.dot(res1.astype(jnp.bfloat16), wq2_ref[...],
                 preferred_element_type=jnp.float32).astype(jnp.bfloat16)
    kv2 = jnp.dot(enc_bf, wkv2_ref[...],
                  preferred_element_type=jnp.float32).astype(jnp.bfloat16)
    ctx2 = attention(q2, kv2, g2_ref, sel2_ref, cmask_ref)
    lin2 = jnp.dot(ctx2.astype(jnp.bfloat16), wo2_ref[...],
                   preferred_element_type=jnp.float32) + b2_ref[...]
    res2 = lin2 + res1

    # ---- LayerNormalization exactly as written in the module:
    #      (x - mean) / unbiased variance  (no sqrt, no eps, no affine) ----
    mean = jnp.mean(res2, axis=-1, keepdims=True)
    centered = res2 - mean
    var = jnp.sum(centered * centered, axis=-1, keepdims=True) * (1.0 / (e - 1))
    ln = centered / var                            # exact reciprocal (review)

    # ---- feed-forward + final residual ----
    lin3 = jnp.dot(ln.astype(jnp.bfloat16), w3_ref[...],
                   preferred_element_type=jnp.float32) + b3_ref[...]
    relu = jnp.maximum(lin3, 0.0).astype(jnp.bfloat16)
    lin4 = jnp.dot(relu, w4_ref[...], preferred_element_type=jnp.float32) + b4_ref[...]
    out_ref[...] = (lin4 + res2).reshape(b, s_t, e).astype(out_ref.dtype)


# ----------------------------------------------------------------------------
# Wrapper (weight permutation / fusion, constant masks, pallas_call)
# ----------------------------------------------------------------------------
# Head h, dim d of the PyTorch layout corresponds to channel c = d*NUM_HEADS + h.
# _PERM maps contiguous index j = h*HEAD_DIM + d  ->  interleaved channel c.
_PERM = np.arange(EMBEDDING_DIM).reshape(HEAD_DIM, NUM_HEADS).T.reshape(-1)


def _in_proj(w, scale=1.0):
    # (E, E): column-permuted so head h occupies contiguous cols [h*hd,(h+1)*hd).
    w = jnp.asarray(w)[:, _PERM]
    if scale != 1.0:
        w = w * scale
    return w.astype(jnp.bfloat16)


def _out_proj(w):
    # nn.Linear weight (E_out, E_in) -> (E_in_contig, E_out) for right-multiply
    # by the head-concatenated context.
    return jnp.asarray(w).T[_PERM, :].astype(jnp.bfloat16)


def _gather_select(b, s_k, h, hd, e):
    """Constant matrices for the block-diagonal attention.

    g  : (b*h*s_k, b*s_k) 0/1 — row (bb,hh,kk) copies K|V row (bb,kk).
    sel: (b*h*s_k, e)     0/1 — 1 where lane c belongs to head hh.
    """
    rows = np.arange(b * h * s_k)
    rb = rows // (h * s_k)
    rh = (rows % (h * s_k)) // s_k
    rk = rows % s_k
    cols = np.arange(b * s_k)
    cb, ck = cols // s_k, cols % s_k
    g = ((rb[:, None] == cb[None, :]) & (rk[:, None] == ck[None, :]))
    sel = rh[:, None] == (np.arange(e) // hd)[None, :]
    return (jnp.asarray(g.astype(np.float32), jnp.bfloat16),
            jnp.asarray(sel.astype(np.float32), jnp.bfloat16))


def _self_mask(b, s_t, h):
    # (b*s_t, b*h*s_t): causal -1000 within batch, -1e9 on cross-batch blocks.
    r = np.arange(b * s_t)
    rb, rq = r // s_t, r % s_t
    c = np.arange(b * h * s_t)
    cb, ck = c // (h * s_t), c % s_t
    m = np.where(rb[:, None] != cb[None, :], KILL,
                 np.where(ck[None, :] > rq[:, None], NEG, 0.0))
    return jnp.asarray(m, jnp.float32)


def _cross_mask(target_mask, s_s, h):
    # (b*s_t, b*h*s_s): per-query-row additive value within batch (module masks
    # query rows, broadcast over keys), -1e9 on cross-batch blocks.
    b, s_t = target_mask.shape
    m = target_mask.astype(jnp.float32)
    mval = jnp.where(m == 0.0, NEG, jnp.where(m == 1.0, 0.0, m))
    rowv = mval.reshape(b * s_t, 1)
    rb = jnp.asarray(np.repeat(np.arange(b), s_t).reshape(b * s_t, 1))
    cb = jnp.asarray((np.arange(b * h * s_s) // (h * s_s)).reshape(1, -1))
    return jnp.where(rb == cb, rowv, KILL).astype(jnp.float32)


def decoder_transformer_layer(input_embeddings_target,
                              token_attention_masks_source,
                              token_attention_masks_target,
                              encoder_output_embedding,
                              params):
    # The PyTorch module only uses token_attention_masks_source for its length;
    # the encoder sequence length is already given by encoder_output_embedding.
    del token_attention_masks_source
    b, s_t, e = input_embeddings_target.shape
    s_s = encoder_output_embedding.shape[1]
    assert b == BATCH_SIZE and e == EMBEDDING_DIM
    h, hd = NUM_HEADS, HEAD_DIM
    scale = 1.0 / math.sqrt(hd)

    g1, sel1 = _gather_select(b, s_t, h, hd, e)
    g2, sel2 = _gather_select(b, s_s, h, hd, e)
    smask = _self_mask(b, s_t, h)
    cmask = _cross_mask(token_attention_masks_target, s_s, h)

    # Fused projection weights (scale folded into the Q columns).
    wqkv1 = jnp.concatenate([_in_proj(params["self_wq"], scale),
                             _in_proj(params["self_wk"]),
                             _in_proj(params["self_wv"])], axis=1)      # (E, 3E)
    wq2 = _in_proj(params["cross_wq"], scale)                           # (E, E)
    wkv2 = jnp.concatenate([_in_proj(params["cross_wk"]),
                            _in_proj(params["cross_wv"])], axis=1)      # (E, 2E)

    args = (
        input_embeddings_target.astype(jnp.float32),
        encoder_output_embedding.astype(jnp.bfloat16),
        smask, cmask, g1, sel1, g2, sel2,
        wqkv1,
        _out_proj(params["w1"]), params["b1"].reshape(1, e).astype(jnp.float32),
        wq2, wkv2,
        _out_proj(params["w2"]), params["b2"].reshape(1, e).astype(jnp.float32),
        params["w3"].T.astype(jnp.bfloat16),
        params["b3"].reshape(1, e).astype(jnp.float32),
        params["w4"].T.astype(jnp.bfloat16),
        params["b4"].reshape(1, e).astype(jnp.float32),
    )

    def full(a):
        nd = a.ndim
        return pl.BlockSpec(a.shape, lambda i, _nd=nd: (0,) * _nd)

    return pl.pallas_call(
        decoder_layer_kernel,
        out_shape=jax.ShapeDtypeStruct((b, s_t, e), jnp.float32),
        grid_spec=pltpu.PrefetchScalarGridSpec(
            num_scalar_prefetch=0,
            grid=(1,),
            in_specs=[full(a) for a in args],
            out_specs=pl.BlockSpec((b, s_t, e), lambda i: (0, 0, 0)),
        ),
        compiler_params=pltpu.CompilerParams(
            dimension_semantics=("arbitrary",)),
    )(*args)


# ----------------------------------------------------------------------------
# Plain-JAX reference (transcription of the PyTorch forward) for verification
# ----------------------------------------------------------------------------
def reference_decoder_layer(x_t, mask_tgt, enc, params):
    b, s_t, e = x_t.shape
    s_s = enc.shape[1]
    h, hd = NUM_HEADS, HEAD_DIM

    def split_heads(y, s):
        y = y.reshape(b, s, hd, h)
        y = jnp.transpose(y, (0, 3, 1, 2))
        return y.reshape(b * h, s, hd)

    def merge_heads(y, s):
        y = y.reshape(b, h, s, hd)
        y = jnp.transpose(y, (0, 2, 3, 1))
        return y.reshape(b, s, hd * h)

    def attention(q_in, kv_in, wq, wk, wv, add_mask, s_q, s_k):
        q = split_heads(q_in @ wq, s_q)
        k = split_heads(kv_in @ wk, s_k)
        v = split_heads(kv_in @ wv, s_k)
        s = jnp.einsum("bqd,bkd->bqk", q, k) / math.sqrt(hd)
        s = s + add_mask
        p = _softmax_lastdim(s)
        return merge_heads(jnp.einsum("bqk,bkd->bqd", p, v), s_q)

    causal = jnp.triu(jnp.full((s_t, s_t), NEG, jnp.float32), k=1)
    self_out = attention(x_t, x_t, params["self_wq"], params["self_wk"],
                         params["self_wv"], causal[None], s_t, s_t)
    lin1 = self_out @ params["w1"].T + params["b1"]
    res1 = lin1 + x_t

    m = mask_tgt.astype(jnp.float32)
    m = jnp.where(m == 0, NEG, jnp.where(m == 1, 0.0, m))
    m = jnp.repeat(m[:, None, :], h, axis=1).reshape(b * h, s_t)[:, :, None]
    cross_out = attention(res1, enc, params["cross_wq"], params["cross_wk"],
                          params["cross_wv"], m, s_t, s_s)
    lin2 = cross_out @ params["w2"].T + params["b2"]
    res2 = lin2 + res1

    mean = jnp.mean(res2, axis=-1, keepdims=True)
    c = res2 - mean
    var = jnp.sum(c * c, axis=-1, keepdims=True) / (e - 1)
    ln = c / var

    lin3 = ln @ params["w3"].T + params["b3"]
    relu = jnp.maximum(lin3, 0.0)
    lin4 = relu @ params["w4"].T + params["b4"]
    return lin4 + res2


# ----------------------------------------------------------------------------
if __name__ == "__main__":
    S_T, S_S = 8, 16
    key = jax.random.PRNGKey(0)
    ks = jax.random.split(key, 20)

    x_t = 0.1 * jax.random.normal(ks[0], (BATCH_SIZE, S_T, EMBEDDING_DIM), jnp.float32)
    enc = 0.1 * jax.random.normal(ks[1], (BATCH_SIZE, S_S, EMBEDDING_DIM), jnp.float32)
    mask_src = jnp.ones((BATCH_SIZE, S_S), jnp.float32)   # contents unused by the module
    mask_tgt = (jax.random.uniform(ks[2], (BATCH_SIZE, S_T)) > 0.25).astype(jnp.float32)

    lin_bound = 1.0 / math.sqrt(EMBEDDING_DIM)

    def attn_w(k):   # mirrors nn.Parameter(torch.rand(E, E))
        return jax.random.uniform(k, (EMBEDDING_DIM, EMBEDDING_DIM), jnp.float32)

    def lin_w(k):    # mirrors nn.Linear default init
        return jax.random.uniform(k, (EMBEDDING_DIM, EMBEDDING_DIM), jnp.float32,
                                  -lin_bound, lin_bound)

    def lin_b(k):
        return jax.random.uniform(k, (EMBEDDING_DIM,), jnp.float32, -lin_bound, lin_bound)

    params = {
        "self_wq": attn_w(ks[3]), "self_wk": attn_w(ks[4]), "self_wv": attn_w(ks[5]),
        "cross_wq": attn_w(ks[6]), "cross_wk": attn_w(ks[7]), "cross_wv": attn_w(ks[8]),
        "w1": lin_w(ks[9]),  "b1": lin_b(ks[10]),
        "w2": lin_w(ks[11]), "b2": lin_b(ks[12]),
        "w3": lin_w(ks[13]), "b3": lin_b(ks[14]),
        "w4": lin_w(ks[15]), "b4": lin_b(ks[16]),
    }

    out = decoder_transformer_layer(x_t, mask_src, mask_tgt, enc, params)
    out = jax.block_until_ready(out)

    ref = reference_decoder_layer(x_t, mask_tgt, enc, params)
    assert out.shape == (BATCH_SIZE, S_T, EMBEDDING_DIM)
    assert bool(jnp.all(jnp.isfinite(out)))
    # bf16 matmul inputs (f32 accumulation) + approx softmax reciprocal introduce
    # ~1% error vs. the all-f32 reference; tolerance sized accordingly.
    rel = float(jnp.max(jnp.abs(out - ref)) / (jnp.max(jnp.abs(ref)) + 1e-6))
    assert rel < 3e-2, f"kernel/reference mismatch: rel={rel}"
    print("KERNEL_OK")
</pallas_src>

<mosaic_0001>
module attributes {stable_mosaic.version = 11 : i64} {
  func.func @decoder_layer_kernel(%arg0: i32, %arg1: memref<2x8x128xf32, #tpu.memory_space<vmem>>, %arg2: memref<2x16x128xbf16, #tpu.memory_space<vmem>>, %arg3: memref<16x128xf32, #tpu.memory_space<vmem>>, %arg4: memref<16x256xf32, #tpu.memory_space<vmem>>, %arg5: memref<128x16xbf16, #tpu.memory_space<vmem>>, %arg6: memref<128x128xbf16, #tpu.memory_space<vmem>>, %arg7: memref<256x32xbf16, #tpu.memory_space<vmem>>, %arg8: memref<256x128xbf16, #tpu.memory_space<vmem>>, %arg9: memref<128x384xbf16, #tpu.memory_space<vmem>>, %arg10: memref<128x128xbf16, #tpu.memory_space<vmem>>, %arg11: memref<1x128xf32, #tpu.memory_space<vmem>>, %arg12: memref<128x128xbf16, #tpu.memory_space<vmem>>, %arg13: memref<128x256xbf16, #tpu.memory_space<vmem>>, %arg14: memref<128x128xbf16, #tpu.memory_space<vmem>>, %arg15: memref<1x128xf32, #tpu.memory_space<vmem>>, %arg16: memref<128x128xbf16, #tpu.memory_space<vmem>>, %arg17: memref<1x128xf32, #tpu.memory_space<vmem>>, %arg18: memref<128x128xbf16, #tpu.memory_space<vmem>>, %arg19: memref<1x128xf32, #tpu.memory_space<vmem>>, %arg20: memref<2x8x128xf32, #tpu.memory_space<vmem>>) attributes {dimension_semantics = [#tpu.dimension_semantics<arbitrary>], iteration_bounds = array<i64: 1>, scalar_prefetch = 0 : i64, scratch_operands = 0 : i64, tpu.core_type = #tpu.core_type<tc>, window_params = [{pipeline_mode = #tpu.pipeline_mode<synchronous>, transform_indices = @transform_0, window_bounds = array<i64: 2, 8, 128>}, {pipeline_mode = #tpu.pipeline_mode<synchronous>, transform_indices = @transform_1, window_bounds = array<i64: 2, 16, 128>}, {pipeline_mode = #tpu.pipeline_mode<synchronous>, transform_indices = @transform_2, window_bounds = array<i64: 16, 128>}, {pipeline_mode = #tpu.pipeline_mode<synchronous>, transform_indices = @transform_3, window_bounds = array<i64: 16, 256>}, {pipeline_mode = #tpu.pipeline_mode<synchronous>, transform_indices = @transform_4, window_bounds = array<i64: 128, 16>}, {pipeline_mode = #tpu.pipeline_mode<synchronous>, transform_indices = @transform_5, window_bounds = array<i64: 128, 128>}, {pipeline_mode = #tpu.pipeline_mode<synchronous>, transform_indices = @transform_6, window_bounds = array<i64: 256, 32>}, {pipeline_mode = #tpu.pipeline_mode<synchronous>, transform_indices = @transform_7, window_bounds = array<i64: 256, 128>}, {pipeline_mode = #tpu.pipeline_mode<synchronous>, transform_indices = @transform_8, window_bounds = array<i64: 128, 384>}, {pipeline_mode = #tpu.pipeline_mode<synchronous>, transform_indices = @transform_9, window_bounds = array<i64: 128, 128>}, {pipeline_mode = #tpu.pipeline_mode<synchronous>, transform_indices = @transform_10, window_bounds = array<i64: 1, 128>}, {pipeline_mode = #tpu.pipeline_mode<synchronous>, transform_indices = @transform_11, window_bounds = array<i64: 128, 128>}, {pipeline_mode = #tpu.pipeline_mode<synchronous>, transform_indices = @transform_12, window_bounds = array<i64: 128, 256>}, {pipeline_mode = #tpu.pipeline_mode<synchronous>, transform_indices = @transform_13, window_bounds = array<i64: 128, 128>}, {pipeline_mode = #tpu.pipeline_mode<synchronous>, transform_indices = @transform_14, window_bounds = array<i64: 1, 128>}, {pipeline_mode = #tpu.pipeline_mode<synchronous>, transform_indices = @transform_15, window_bounds = array<i64: 128, 128>}, {pipeline_mode = #tpu.pipeline_mode<synchronous>, transform_indices = @transform_16, window_bounds = array<i64: 1, 128>}, {pipeline_mode = #tpu.pipeline_mode<synchronous>, transform_indices = @transform_17, window_bounds = array<i64: 128, 128>}, {pipeline_mode = #tpu.pipeline_mode<synchronous>, transform_indices = @transform_18, window_bounds = array<i64: 1, 128>}, {pipeline_mode = #tpu.pipeline_mode<synchronous>, transform_indices = @transform_19, window_bounds = array<i64: 2, 8, 128>}]} {
    %c0 = arith.constant 0 : index
    %c0_0 = arith.constant 0 : index
    %c0_1 = arith.constant 0 : index
    %0 = vector.load %arg1[%c0, %c0_0, %c0_1] : memref<2x8x128xf32, #tpu.memory_space<vmem>>, vector<2x8x128xf32>
    %1 = vector.shape_cast %0 : vector<2x8x128xf32> to vector<16x128xf32>
    %2 = arith.truncf %1 : vector<16x128xf32> to vector<16x128xbf16>
    %c0_2 = arith.constant 0 : index
    %c0_3 = arith.constant 0 : index
    %c0_4 = arith.constant 0 : index
    %3 = vector.load %arg2[%c0_2, %c0_3, %c0_4] : memref<2x16x128xbf16, #tpu.memory_space<vmem>>, vector<2x16x128xbf16>
    %4 = vector.shape_cast %3 : vector<2x16x128xbf16> to vector<32x128xbf16>
    %c0_5 = arith.constant 0 : index
    %c0_6 = arith.constant 0 : index
    %5 = vector.load %arg9[%c0_5, %c0_6] : memref<128x384xbf16, #tpu.memory_space<vmem>>, vector<128x384xbf16>
    %cst = arith.constant dense<0.000000e+00> : vector<16x384xf32>
    %6 = tpu.matmul %2, %5, %cst {dimension_numbers = #tpu.dot_dimension_numbers<[1], [0], [0], [1], [0, 0, 1, 1], [], []>} : vector<16x128xbf16>, vector<128x384xbf16>, vector<16x384xf32> -> vector<16x384xf32>
    %7 = arith.truncf %6 : vector<16x384xf32> to vector<16x384xbf16>
    %8 = vector.extract_strided_slice %7 {offsets = [0, 0], sizes = [16, 128], strides = [1, 1]} : vector<16x384xbf16> to vector<16x128xbf16>
    %9 = vector.extract_strided_slice %7 {offsets = [0, 128], sizes = [16, 256], strides = [1, 1]} : vector<16x384xbf16> to vector<16x256xbf16>
    %c0_7 = arith.constant 0 : index
    %c0_8 = arith.constant 0 : index
    %10 = vector.load %arg6[%c0_7, %c0_8] : memref<128x128xbf16, #tpu.memory_space<vmem>>, vector<128x128xbf16>
    %c0_9 = arith.constant 0 : index
    %c0_10 = arith.constant 0 : index
    %11 = vector.load %arg5[%c0_9, %c0_10] : memref<128x16xbf16, #tpu.memory_space<vmem>>, vector<128x16xbf16>
    %cst_11 = arith.constant dense<0.000000e+00> : vector<128x256xf32>
    %12 = tpu.matmul %11, %9, %cst_11 {dimension_numbers = #tpu.dot_dimension_numbers<[1], [0], [0], [1], [0, 0, 1, 1], [], []>} : vector<128x16xbf16>, vector<16x256xbf16>, vector<128x256xf32> -> vector<128x256xf32>
    %13 = arith.truncf %12 : vector<128x256xf32> to vector<128x256xbf16>
    %14 = vector.extract_strided_slice %13 {offsets = [0, 0], sizes = [128, 128], strides = [1, 1]} : vector<128x256xbf16> to vector<128x128xbf16>
    %15 = arith.mulf %14, %10 : vector<128x128xbf16>
    %16 = vector.extract_strided_slice %13 {offsets = [0, 128], sizes = [128, 128], strides = [1, 1]} : vector<128x256xbf16> to vector<128x128xbf16>
    %17 = arith.mulf %16, %10 : vector<128x128xbf16>
    %cst_12 = arith.constant dense<0.000000e+00> : vector<16x128xf32>
    %18 = tpu.matmul %8, %15, %cst_12 {dimension_numbers = #tpu.dot_dimension_numbers<[1], [1], [0], [0], [0, 0, 1, 0], [], []>} : vector<16x128xbf16>, vector<128x128xbf16>, vector<16x128xf32> -> vector<16x128xf32>
    %c0_13 = arith.constant 0 : index
    %c0_14 = arith.constant 0 : index
    %19 = vector.load %arg3[%c0_13, %c0_14] : memref<16x128xf32, #tpu.memory_space<vmem>>, vector<16x128xf32>
    %20 = arith.addf %18, %19 : vector<16x128xf32>
    %cst_15 = arith.constant dense<0xFF800000> : vector<16xf32>
    %21 = vector.multi_reduction <maximumf>, %20, %cst_15 [1] : vector<16x128xf32> to vector<16xf32>
    %22 = vector.shape_cast %21 : vector<16xf32> to vector<16x1xf32>
    %23 = vector.broadcast %22 : vector<16x1xf32> to vector<16x128xf32>
    %24 = arith.subf %20, %23 : vector<16x128xf32>
    %25 = math.exp %24 : vector<16x128xf32>
    %26 = arith.truncf %25 : vector<16x128xf32> to vector<16x128xbf16>
    %cst_16 = arith.constant dense<0.000000e+00> : vector<16x128xf32>
    %27 = tpu.matmul %26, %17, %cst_16 {dimension_numbers = #tpu.dot_dimension_numbers<[1], [0], [0], [1], [0, 0, 1, 1], [], []>} : vector<16x128xbf16>, vector<128x128xbf16>, vector<16x128xf32> -> vector<16x128xf32>
    %cst_17 = arith.constant dense<0.000000e+00> : vector<16x128xf32>
    %28 = tpu.matmul %26, %10, %cst_17 {dimension_numbers = #tpu.dot_dimension_numbers<[1], [0], [0], [1], [0, 0, 1, 1], [], []>} : vector<16x128xbf16>, vector<128x128xbf16>, vector<16x128xf32> -> vector<16x128xf32>
    %29 = tpu.reciprocal %28 {approx = true} : vector<16x128xf32> -> vector<16x128xf32>
    %30 = arith.mulf %27, %29 : vector<16x128xf32>
    %31 = arith.truncf %30 : vector<16x128xf32> to vector<16x128xbf16>
    %c0_18 = arith.constant 0 : index
    %c0_19 = arith.constant 0 : index
    %32 = vector.load %arg10[%c0_18, %c0_19] : memref<128x128xbf16, #tpu.memory_space<vmem>>, vector<128x128xbf16>
    %cst_20 = arith.constant dense<0.000000e+00> : vector<16x128xf32>
    %33 = tpu.matmul %31, %32, %cst_20 {dimension_numbers = #tpu.dot_dimension_numbers<[1], [0], [0], [1], [0, 0, 1, 1], [], []>} : vector<16x128xbf16>, vector<128x128xbf16>, vector<16x128xf32> -> vector<16x128xf32>
    %c0_21 = arith.constant 0 : index
    %c0_22 = arith.constant 0 : index
    %34 = vector.load %arg11[%c0_21, %c0_22] : memref<1x128xf32, #tpu.memory_space<vmem>>, vector<1x128xf32>
    %35 = vector.broadcast %34 : vector<1x128xf32> to vector<16x128xf32>
    %36 = arith.addf %33, %35 : vector<16x128xf32>
    %37 = arith.addf %36, %1 : vector<16x128xf32>
    %38 = arith.truncf %37 : vector<16x128xf32> to vector<16x128xbf16>
    %c0_23 = arith.constant 0 : index
    %c0_24 = arith.constant 0 : index
    %39 = vector.load %arg12[%c0_23, %c0_24] : memref<128x128xbf16, #tpu.memory_space<vmem>>, vector<128x128xbf16>
    %cst_25 = arith.constant dense<0.000000e+00> : vector<16x128xf32>
    %40 = tpu.matmul %38, %39, %cst_25 {dimension_numbers = #tpu.dot_dimension_numbers<[1], [0], [0], [1], [0, 0, 1, 1], [], []>} : vector<16x128xbf16>, vector<128x128xbf16>, vector<16x128xf32> -> vector<16x128xf32>
    %41 = arith.truncf %40 : vector<16x128xf32> to vector<16x128xbf16>
    %c0_26 = arith.constant 0 : index
    %c0_27 = arith.constant 0 : index
    %42 = vector.load %arg13[%c0_26, %c0_27] : memref<128x256xbf16, #tpu.memory_space<vmem>>, vector<128x256xbf16>
    %cst_28 = arith.constant dense<0.000000e+00> : vector<32x256xf32>
    %43 = tpu.matmul %4, %42, %cst_28 {dimension_numbers = #tpu.dot_dimension_numbers<[1], [0], [0], [1], [0, 0, 1, 1], [], []>} : vector<32x128xbf16>, vector<128x256xbf16>, vector<32x256xf32> -> vector<32x256xf32>
    %44 = arith.truncf %43 : vector<32x256xf32> to vector<32x256xbf16>
    %c0_29 = arith.constant 0 : index
    %c0_30 = arith.constant 0 : index
    %45 = vector.load %arg8[%c0_29, %c0_30] : memref<256x128xbf16, #tpu.memory_space<vmem>>, vector<256x128xbf16>
    %c0_31 = arith.constant 0 : index
    %c0_32 = arith.constant 0 : index
    %46 = vector.load %arg7[%c0_31, %c0_32] : memref<256x32xbf16, #tpu.memory_space<vmem>>, vector<256x32xbf16>
    %cst_33 = arith.constant dense<0.000000e+00> : vector<256x256xf32>
    %47 = tpu.matmul %46, %44, %cst_33 {dimension_numbers = #tpu.dot_dimension_numbers<[1], [0], [0], [1], [0, 0, 1, 1], [], []>} : vector<256x32xbf16>, vector<32x256xbf16>, vector<256x256xf32> -> vector<256x256xf32>
    %48 = arith.truncf %47 : vector<256x256xf32> to vector<256x256xbf16>
    %49 = vector.extract_strided_slice %48 {offsets = [0, 0], sizes = [256, 128], strides = [1, 1]} : vector<256x256xbf16> to vector<256x128xbf16>
    %50 = arith.mulf %49, %45 : vector<256x128xbf16>
    %51 = vector.extract_strided_slice %48 {offsets = [0, 128], sizes = [256, 128], strides = [1, 1]} : vector<256x256xbf16> to vector<256x128xbf16>
    %52 = arith.mulf %51, %45 : vector<256x128xbf16>
    %cst_34 = arith.constant dense<0.000000e+00> : vector<16x256xf32>
    %53 = tpu.matmul %41, %50, %cst_34 {dimension_numbers = #tpu.dot_dimension_numbers<[1], [1], [0], [0], [0, 0, 1, 0], [], []>} : vector<16x128xbf16>, vector<256x128xbf16>, vector<16x256xf32> -> vector<16x256xf32>
    %c0_35 = arith.constant 0 : index
    %c0_36 = arith.constant 0 : index
    %54 = vector.load %arg4[%c0_35, %c0_36] : memref<16x256xf32, #tpu.memory_space<vmem>>, vector<16x256xf32>
    %55 = arith.addf %53, %54 : vector<16x256xf32>
    %cst_37 = arith.constant dense<0xFF800000> : vector<16xf32>
    %56 = vector.multi_reduction <maximumf>, %55, %cst_37 [1] : vector<16x256xf32> to vector<16xf32>
    %57 = vector.shape_cast %56 : vector<16xf32> to vector<16x1xf32>
    %58 = vector.broadcast %57 : vector<16x1xf32> to vector<16x256xf32>
    %59 = arith.subf %55, %58 : vector<16x256xf32>
    %60 = math.exp %59 : vector<16x256xf32>
    %61 = arith.truncf %60 : vector<16x256xf32> to vector<16x256xbf16>
    %cst_38 = arith.constant dense<0.000000e+00> : vector<16x128xf32>
    %62 = tpu.matmul %61, %52, %cst_38 {dimension_numbers = #tpu.dot_dimension_numbers<[1], [0], [0], [1], [0, 0, 1, 1], [], []>} : vector<16x256xbf16>, vector<256x128xbf16>, vector<16x128xf32> -> vector<16x128xf32>
    %cst_39 = arith.constant dense<0.000000e+00> : vector<16x128xf32>
    %63 = tpu.matmul %61, %45, %cst_39 {dimension_numbers = #tpu.dot_dimension_numbers<[1], [0], [0], [1], [0, 0, 1, 1], [], []>} : vector<16x256xbf16>, vector<256x128xbf16>, vector<16x128xf32> -> vector<16x128xf32>
    %64 = tpu.reciprocal %63 {approx = true} : vector<16x128xf32> -> vector<16x128xf32>
    %65 = arith.mulf %62, %64 : vector<16x128xf32>
    %66 = arith.truncf %65 : vector<16x128xf32> to vector<16x128xbf16>
    %c0_40 = arith.constant 0 : index
    %c0_41 = arith.constant 0 : index
    %67 = vector.load %arg14[%c0_40, %c0_41] : memref<128x128xbf16, #tpu.memory_space<vmem>>, vector<128x128xbf16>
    %cst_42 = arith.constant dense<0.000000e+00> : vector<16x128xf32>
    %68 = tpu.matmul %66, %67, %cst_42 {dimension_numbers = #tpu.dot_dimension_numbers<[1], [0], [0], [1], [0, 0, 1, 1], [], []>} : vector<16x128xbf16>, vector<128x128xbf16>, vector<16x128xf32> -> vector<16x128xf32>
    %c0_43 = arith.constant 0 : index
    %c0_44 = arith.constant 0 : index
    %69 = vector.load %arg15[%c0_43, %c0_44] : memref<1x128xf32, #tpu.memory_space<vmem>>, vector<1x128xf32>
    %70 = vector.broadcast %69 : vector<1x128xf32> to vector<16x128xf32>
    %71 = arith.addf %68, %70 : vector<16x128xf32>
    %72 = arith.addf %71, %37 : vector<16x128xf32>
    %cst_45 = arith.constant dense<0.000000e+00> : vector<16xf32>
    %73 = vector.multi_reduction <add>, %72, %cst_45 [1] : vector<16x128xf32> to vector<16xf32>
    %74 = vector.shape_cast %73 : vector<16xf32> to vector<16x1xf32>
    %cst_46 = arith.constant 1.280000e+02 : f32
    %75 = vector.broadcast %cst_46 : f32 to vector<16x1xf32>
    %76 = arith.divf %74, %75 : vector<16x1xf32>
    %77 = vector.broadcast %76 : vector<16x1xf32> to vector<16x128xf32>
    %78 = arith.subf %72, %77 : vector<16x128xf32>
    %79 = arith.mulf %78, %78 : vector<16x128xf32>
    %cst_47 = arith.constant dense<0.000000e+00> : vector<16xf32>
    %80 = vector.multi_reduction <add>, %79, %cst_47 [1] : vector<16x128xf32> to vector<16xf32>
    %81 = vector.shape_cast %80 : vector<16xf32> to vector<16x1xf32>
    %cst_48 = arith.constant 0.00787401571 : f32
    %82 = vector.broadcast %cst_48 : f32 to vector<16x1xf32>
    %83 = arith.mulf %81, %82 : vector<16x1xf32>
    %84 = vector.broadcast %83 : vector<16x1xf32> to vector<16x128xf32>
    %85 = arith.divf %78, %84 : vector<16x128xf32>
    %86 = arith.truncf %85 : vector<16x128xf32> to vector<16x128xbf16>
    %c0_49 = arith.constant 0 : index
    %c0_50 = arith.constant 0 : index
    %87 = vector.load %arg16[%c0_49, %c0_50] : memref<128x128xbf16, #tpu.memory_space<vmem>>, vector<128x128xbf16>
    %cst_51 = arith.constant dense<0.000000e+00> : vector<16x128xf32>
    %88 = tpu.matmul %86, %87, %cst_51 {dimension_numbers = #tpu.dot_dimension_numbers<[1], [0], [0], [1], [0, 0, 1, 1], [], []>} : vector<16x128xbf16>, vector<128x128xbf16>, vector<16x128xf32> -> vector<16x128xf32>
    %c0_52 = arith.constant 0 : index
    %c0_53 = arith.constant 0 : index
    %89 = vector.load %arg17[%c0_52, %c0_53] : memref<1x128xf32, #tpu.memory_space<vmem>>, vector<1x128xf32>
    %90 = vector.broadcast %89 : vector<1x128xf32> to vector<16x128xf32>
    %91 = arith.addf %88, %90 : vector<16x128xf32>
    %cst_54 = arith.constant 0.000000e+00 : f32
    %92 = vector.broadcast %cst_54 : f32 to vector<16x128xf32>
    %93 = arith.maximumf %91, %92 : vector<16x128xf32>
    %94 = arith.truncf %93 : vector<16x128xf32> to vector<16x128xbf16>
    %c0_55 = arith.constant 0 : index
    %c0_56 = arith.constant 0 : index
    %95 = vector.load %arg18[%c0_55, %c0_56] : memref<128x128xbf16, #tpu.memory_space<vmem>>, vector<128x128xbf16>
    %cst_57 = arith.constant dense<0.000000e+00> : vector<16x128xf32>
    %96 = tpu.matmul %94, %95, %cst_57 {dimension_numbers = #tpu.dot_dimension_numbers<[1], [0], [0], [1], [0, 0, 1, 1], [], []>} : vector<16x128xbf16>, vector<128x128xbf16>, vector<16x128xf32> -> vector<16x128xf32>
    %c0_58 = arith.constant 0 : index
    %c0_59 = arith.constant 0 : index
    %97 = vector.load %arg19[%c0_58, %c0_59] : memref<1x128xf32, #tpu.memory_space<vmem>>, vector<1x128xf32>
    %98 = vector.broadcast %97 : vector<1x128xf32> to vector<16x128xf32>
    %99 = arith.addf %96, %98 : vector<16x128xf32>
    %100 = arith.addf %99, %72 : vector<16x128xf32>
    %101 = vector.shape_cast %100 : vector<16x128xf32> to vector<2x8x128xf32>
    %c0_60 = arith.constant 0 : index
    %c0_61 = arith.constant 0 : index
    %c0_62 = arith.constant 0 : index
    %102 = vector.load %arg20[%c0_60, %c0_61, %c0_62] : memref<2x8x128xf32, #tpu.memory_space<vmem>>, vector<2x8x128xf32>
    tpu.vector_store %arg20[%c0_60, %c0_61, %c0_62], %101 {strides = array<i32>} : memref<2x8x128xf32, #tpu.memory_space<vmem>>, vector<2x8x128xf32>,
    return
  }
  func.func @transform_0(%arg0: i32) -> (i32, i32, i32) {
    %c0_i32 = arith.constant 0 : i32
    %c0_i32_0 = arith.constant 0 : i32
    %c0_i32_1 = arith.constant 0 : i32
    %c0_i32_2 = arith.constant 0 : i32
    return %c0_i32, %c0_i32_0, %c0_i32_1 : i32, i32, i32
  }
  func.func @transform_1(%arg0: i32) -> (i32, i32, i32) {
    %c0_i32 = arith.constant 0 : i32
    %c0_i32_0 = arith.constant 0 : i32
    %c0_i32_1 = arith.constant 0 : i32
    %c0_i32_2 = arith.constant 0 : i32
    return %c0_i32, %c0_i32_0, %c0_i32_1 : i32, i32, i32
  }
  func.func @transform_2(%arg0: i32) -> (i32, i32) {
    %c0_i32 = arith.constant 0 : i32
    %c0_i32_0 = arith.constant 0 : i32
    %c0_i32_1 = arith.constant 0 : i32
    return %c0_i32, %c0_i32_0 : i32, i32
  }
  func.func @transform_3(%arg0: i32) -> (i32, i32) {
    %c0_i32 = arith.constant 0 : i32
    %c0_i32_0 = arith.constant 0 : i32
    %c0_i32_1 = arith.constant 0 : i32
    return %c0_i32, %c0_i32_0 : i32, i32
  }
  func.func @transform_4(%arg0: i32) -> (i32, i32) {
    %c0_i32 = arith.constant 0 : i32
    %c0_i32_0 = arith.constant 0 : i32
    %c0_i32_1 = arith.constant 0 : i32
    return %c0_i32, %c0_i32_0 : i32, i32
  }
  func.func @transform_5(%arg0: i32) -> (i32, i32) {
    %c0_i32 = arith.constant 0 : i32
    %c0_i32_0 = arith.constant 0 : i32
    %c0_i32_1 = arith.constant 0 : i32
    return %c0_i32, %c0_i32_0 : i32, i32
  }
  func.func @transform_6(%arg0: i32) -> (i32, i32) {
    %c0_i32 = arith.constant 0 : i32
    %c0_i32_0 = arith.constant 0 : i32
    %c0_i32_1 = arith.constant 0 : i32
    return %c0_i32, %c0_i32_0 : i32, i32
  }
  func.func @transform_7(%arg0: i32) -> (i32, i32) {
    %c0_i32 = arith.constant 0 : i32
    %c0_i32_0 = arith.constant 0 : i32
    %c0_i32_1 = arith.constant 0 : i32
    return %c0_i32, %c0_i32_0 : i32, i32
  }
  func.func @transform_8(%arg0: i32) -> (i32, i32) {
    %c0_i32 = arith.constant 0 : i32
    %c0_i32_0 = arith.constant 0 : i32
    %c0_i32_1 = arith.constant 0 : i32
    return %c0_i32, %c0_i32_0 : i32, i32
  }
  func.func @transform_9(%arg0: i32) -> (i32, i32) {
    %c0_i32 = arith.constant 0 : i32
    %c0_i32_0 = arith.constant 0 : i32
    %c0_i32_1 = arith.constant 0 : i32
    return %c0_i32, %c0_i32_0 : i32, i32
  }
  func.func @transform_10(%arg0: i32) -> (i32, i32) {
    %c0_i32 = arith.constant 0 : i32
    %c0_i32_0 = arith.constant 0 : i32
    %c0_i32_1 = arith.constant 0 : i32
    return %c0_i32, %c0_i32_0 : i32, i32
  }
  func.func @transform_11(%arg0: i32) -> (i32, i32) {
    %c0_i32 = arith.constant 0 : i32
    %c0_i32_0 = arith.constant 0 : i32
    %c0_i32_1 = arith.constant 0 : i32
    return %c0_i32, %c0_i32_0 : i32, i32
  }
  func.func @transform_12(%arg0: i32) -> (i32, i32) {
    %c0_i32 = arith.constant 0 : i32
    %c0_i32_0 = arith.constant 0 : i32
    %c0_i32_1 = arith.constant 0 : i32
    return %c0_i32, %c0_i32_0 : i32, i32
  }
  func.func @transform_13(%arg0: i32) -> (i32, i32) {
    %c0_i32 = arith.constant 0 : i32
    %c0_i32_0 = arith.constant 0 : i32
    %c0_i32_1 = arith.constant 0 : i32
    return %c0_i32, %c0_i32_0 : i32, i32
  }
  func.func @transform_14(%arg0: i32) -> (i32, i32) {
    %c0_i32 = arith.constant 0 : i32
    %c0_i32_0 = arith.constant 0 : i32
    %c0_i32_1 = arith.constant 0 : i32
    return %c0_i32, %c0_i32_0 : i32, i32
  }
  func.func @transform_15(%arg0: i32) -> (i32, i32) {
    %c0_i32 = arith.constant 0 : i32
    %c0_i32_0 = arith.constant 0 : i32
    %c0_i32_1 = arith.constant 0 : i32
    return %c0_i32, %c0_i32_0 : i32, i32
  }
  func.func @transform_16(%arg0: i32) -> (i32, i32) {
    %c0_i32 = arith.constant 0 : i32
    %c0_i32_0 = arith.constant 0 : i32
    %c0_i32_1 = arith.constant 0 : i32
    return %c0_i32, %c0_i32_0 : i32, i32
  }
  func.func @transform_17(%arg0: i32) -> (i32, i32) {
    %c0_i32 = arith.constant 0 : i32
    %c0_i32_0 = arith.constant 0 : i32
    %c0_i32_1 = arith.constant 0 : i32
    return %c0_i32, %c0_i32_0 : i32, i32
  }
  func.func @transform_18(%arg0: i32) -> (i32, i32) {
    %c0_i32 = arith.constant 0 : i32
    %c0_i32_0 = arith.constant 0 : i32
    %c0_i32_1 = arith.constant 0 : i32
    return %c0_i32, %c0_i32_0 : i32, i32
  }
  func.func @transform_19(%arg0: i32) -> (i32, i32, i32) {
    %c0_i32 = arith.constant 0 : i32
    %c0_i32_0 = arith.constant 0 : i32
    %c0_i32_1 = arith.constant 0 : i32
    %c0_i32_2 = arith.constant 0 : i32
    return %c0_i32, %c0_i32_0, %c0_i32_1 : i32, i32, i32
  }
}

</mosaic_0001>

<bundles_post_ra>
// kernel: tpu_custom_call.1
= control target key start
LH: loop header
LB: loop body
LE: loop exit
PB: predicated region body
PF: predicated region fallthrough
CT: control target
= control target key end

     0   :  { %s4249_s0 = inlined_call_operand.hbm [shape: f32[2,8,128], index: 0, kind: input, shape index: {}]   ;;  %s4250_s1 = inlined_call_operand.hbm [shape: bf16[2,16,128], index: 1, kind: input, shape index: {}]   ;;  %s4251_s2 = inlined_call_operand.hbm [shape: f32[16,128], index: 2, kind: input, shape index: {}]   ;;  %s4252_s3 = inlined_call_operand.hbm [shape: f32[16,256], index: 3, kind: input, shape index: {}]   ;;  %s4253_s4 = inlined_call_operand.vmem [shape: bf16[128,16], index: 4, kind: input, shape index: {}]   ;;  %s4254_s5 = inlined_call_operand.vmem [shape: bf16[128,128], index: 5, kind: input, shape index: {}]   ;;  %s4255_s6 = inlined_call_operand.vmem [shape: bf16[256,32], index: 6, kind: input, shape index: {}]   ;;  %s4256_s7 = inlined_call_operand.hbm [shape: bf16[256,128], index: 7, kind: input, shape index: {}]   ;;  %s4257_s8 = inlined_call_operand.vmem [shape: bf16[128,384], index: 8, kind: input, shape index: {}]   ;;  %s4258_s9 = inlined_call_operand.hbm [shape: bf16[128,128], index: 9, kind: input, shape index: {}]   ;;  %s4259_s10 = inlined_call_operand.vmem [shape: f32[1,128], index: 10, kind: input, shape index: {}]   ;;  %s4260_s11 = inlined_call_operand.hbm [shape: bf16[128,128], index: 11, kind: input, shape index: {}]   ;;  %s4261_s12 = inlined_call_operand.hbm [shape: bf16[128,256], index: 12, kind: input, shape index: {}]   ;;  %s4262_s13 = inlined_call_operand.hbm [shape: bf16[128,128], index: 13, kind: input, shape index: {}]   ;;  %s4263_s14 = inlined_call_operand.vmem [shape: f32[1,128], index: 14, kind: input, shape index: {}]   ;;  %s4264_s15 = inlined_call_operand.hbm [shape: bf16[128,128], index: 15, kind: input, shape index: {}]   ;;  %s4265_s16 = inlined_call_operand.vmem [shape: f32[1,128], index: 16, kind: input, shape index: {}]   ;;  %s4266_s17 = inlined_call_operand.hbm [shape: bf16[128,128], index: 17, kind: input, shape index: {}]   ;;  %s4267_s18 = inlined_call_operand.vmem [shape: f32[1,128], index: 18, kind: input, shape index: {}]   ;;  %s4268_s19 = inlined_call_operand.hbm [shape: f32[2,8,128], index: 19, kind: output, shape index: {}]  }
   0x1   :  { %4278 = sst [smem:[#allocation28_spill]] %s4249_s0 }
   0x2   :  { %4279 = sst [smem:[#allocation29_spill]] %s4250_s1 }
   0x3   :  { %4280 = sst [smem:[#allocation30_spill]] %s4251_s2 }
   0x4   :  { %4281 = sst [smem:[#allocation31_spill]] %s4252_s3 }
   0x5   :  { %4282 = sst [smem:[#allocation32_spill]] %s4267_s18 }
   0x6   :  { %4283 = sst [smem:[#allocation33_spill]] %s4268_s19 }
   0x7   :  { %24 = vsyncpa [#allocation3], 0 }
   0x8   :  { %25 = vsyncpa [#allocation6], 0 }
   0x9   :  { %26 = vsyncpa [#allocation9], 0 }
   0xa   :  { %27 = vsyncpa [#allocation12], 0 }
   0xb   :  { %28 = vsyncpa [#allocation15], 0 }
   0xc   :  { %29 = vsyncpa [#allocation18], 0 }
   0xd   :  { %30 = vsyncpa [#allocation4], 0  ;;  %s3323_s0 = smov [#allocation5]   ;;  %s4284_s1 = sld [smem:[#allocation29_spill]] }
   0xe   :  { %s48_s30 = sshll.u32 %s3323_s0, 4  ;;  %s49_s30 = int_to_ptr.vmem [resolvable:$true] %s48_s30 }
  0x13   :  { %s3045_s22 = scalar_lea.hbm %s4284_s1, 256 }
  0x14   :  { %p3046_p0 = scmp.ne.s32.totalorder %s4284_s1, %s3045_s22  ;;  %p3049_p1 = scmp.lt.u32.totalorder %s3045_s22, %s4284_s1 }
  0x16   :  { %p3051_p2 = pnand %p3049_p1, %p3046_p0 }
  0x18   :  { %3054 = shalt.err (!%p3051_p2)
}
  0x19   :  { %s3055_s3 = scalar_lea.vmem %s49_s30, 256  ;;  %p3060_p4 = scmp.lt.s32.totalorder %s49_s30, %s49_s30 }
  0x1a   :  { %p3056_p3 = scmp.ne.s32.totalorder %s49_s30, %s3055_s3  ;;  %p3061_p5 = scmp.lt.s32.totalorder %s3055_s3, %s3055_s3 }
  0x1c   :  { %p3062_p6 = por %p3061_p5, %p3060_p4 }
  0x1e   :  { %p3063_p7 = pnand %p3062_p6, %p3056_p3 }
  0x20   :  { %3066 = shalt.err (!%p3063_p7)
}
  0x21   :  { %s4274_s26 = smov 64   ;;  %s3325_s27 = smov 4  }
  0x22   :  { %54 = dma.hbm_to_vmem [thread:$0]  %s4284_s1, 256, %s49_s30, [#allocation6], %s4274_s26, %s4274_s26, %s3325_s27  }
  0x23   :  { %s3326_s0 = smov [#allocation8]   ;;  %s4285_s2 = sld [smem:[#allocation31_spill]] }
  0x24   :  { %s72_s20 = sshll.u32 %s3326_s0, 4  ;;  %s73_s20 = int_to_ptr.vmem [resolvable:$true] %s72_s20 }
  0x29   :  { %s3067_s23 = scalar_lea.hbm %s4285_s2, 512 }
  0x2a   :  { %p3068_p8 = scmp.ne.s32.totalorder %s4285_s2, %s3067_s23  ;;  %p3071_p9 = scmp.lt.u32.totalorder %s3067_s23, %s4285_s2 }
  0x2c   :  { %p3073_p10 = pnand %p3071_p9, %p3068_p8 }
  0x2e   :  { %3076 = shalt.err (!%p3073_p10)
}
  0x2f   :  { %s3077_s18 = scalar_lea.vmem %s73_s20, 512  ;;  %p3082_p12 = scmp.lt.s32.totalorder %s73_s20, %s73_s20 }
  0x30   :  { %p3078_p11 = scmp.ne.s32.totalorder %s73_s20, %s3077_s18  ;;  %p3083_p13 = scmp.lt.s32.totalorder %s3077_s18, %s3077_s18 }
  0x32   :  { %p3084_p0 = por %p3083_p13, %p3082_p12 }
  0x34   :  { %p3085_p1 = pnand %p3084_p0, %p3078_p11 }
  0x36   :  { %3088 = shalt.err (!%p3085_p1)
}
  0x37   :  { %s3327_s30 = smov 256   ;;  %s3328_s1 = smov 16  }
  0x38   :  { %78 = dma.hbm_to_vmem [thread:$0]  %s4285_s2, 512, %s73_s20, [#allocation9], %s3327_s30, %s3327_s30, %s3328_s1  }
  0x39   :  { %s3329_s0 = smov [#allocation11]   ;;  %s3089_s23 = scalar_lea.hbm %s4258_s9, 1024 }
  0x3a   :  { %s104_s21 = sshll.u32 %s3329_s0, 4  ;;  %p3090_p2 = scmp.ne.s32.totalorder %s4258_s9, %s3089_s23  ;;  %s105_s21 = int_to_ptr.vmem [resolvable:$true] %s104_s21 }
  0x3b   :  { %p3093_p3 = scmp.lt.u32.totalorder %s3089_s23, %s4258_s9 }
  0x3d   :  { %p3095_p4 = pnand %p3093_p3, %p3090_p2 }
  0x3f   :  { %3098 = shalt.err (!%p3095_p4)
}
  0x40   :  { %s3099_s26 = scalar_lea.vmem %s105_s21, 1024  ;;  %p3104_p6 = scmp.lt.s32.totalorder %s105_s21, %s105_s21 }
  0x41   :  { %p3100_p5 = scmp.ne.s32.totalorder %s105_s21, %s3099_s26  ;;  %p3105_p7 = scmp.lt.s32.totalorder %s3099_s26, %s3099_s26 }
  0x43   :  { %p3106_p8 = por %p3105_p7, %p3104_p6 }
  0x45   :  { %p3107_p9 = pnand %p3106_p8, %p3100_p5 }
  0x47   :  { %3110 = shalt.err (!%p3107_p9)
}
  0x48   :  { %s4286_s20 = smov 64   ;;  %s3330_s1 = smov [#allocation14]  }
  0x49   :  { %110 = dma.hbm_to_vmem [thread:$0]  %s4258_s9, 1024, %s105_s21, [#allocation12], %s4286_s20, %s4286_s20, %s3325_s27  }
  0x4a   :  { %s130_s28 = sshll.u32 %s3330_s1, 4  ;;  %s3331_s29 = smov [#allocation17]   ;;  %s131_s28 = int_to_ptr.vmem [resolvable:$true] %s130_s28 }
  0x4b   :  { %s156_s0 = sshll.u32 %s3331_s29, 4  ;;  %s3111_s23 = scalar_lea.hbm %s4261_s12, 2048  ;;  %s157_s0 = int_to_ptr.vmem [resolvable:$true] %s156_s0 }
  0x4c   :  { %p3112_p10 = scmp.ne.s32.totalorder %s4261_s12, %s3111_s23  ;;  %p3115_p11 = scmp.lt.u32.totalorder %s3111_s23, %s4261_s12 }
  0x4e   :  { %p3117_p12 = pnand %p3115_p11, %p3112_p10 }
  0x50   :  { %3120 = shalt.err (!%p3117_p12)
}
  0x51   :  { %s3121_s9 = scalar_lea.vmem %s131_s28, 2048  ;;  %p3126_p0 = scmp.lt.s32.totalorder %s131_s28, %s131_s28 }
  0x52   :  { %p3122_p13 = scmp.ne.s32.totalorder %s131_s28, %s3121_s9  ;;  %p3127_p1 = scmp.lt.s32.totalorder %s3121_s9, %s3121_s9 }
  0x54   :  { %p3128_p2 = por %p3127_p1, %p3126_p0 }
  0x56   :  { %p3129_p3 = pnand %p3128_p2, %p3122_p13 }
  0x58   :  { %3132 = shalt.err (!%p3129_p3)
}
  0x59   :  { %s3332_s21 = smov 128   ;;  %s3333_s3 = smov 8  }
  0x5a   :  { %136 = dma.hbm_to_vmem [thread:$0]  %s4261_s12, 2048, %s131_s28, [#allocation15], %s3332_s21, %s3332_s21, %s3333_s3  }
  0x5b   :  { %s3133_s19 = scalar_lea.hbm %s4264_s15, 1024 }
  0x5c   :  { %p3134_p4 = scmp.ne.s32.totalorder %s4264_s15, %s3133_s19  ;;  %p3137_p5 = scmp.lt.u32.totalorder %s3133_s19, %s4264_s15 }
  0x5e   :  { %p3139_p6 = pnand %p3137_p5, %p3134_p4 }
  0x60   :  { %3142 = shalt.err (!%p3139_p6)
}
  0x61   :  { %s3143_s25 = scalar_lea.vmem %s157_s0, 1024  ;;  %p3148_p8 = scmp.lt.s32.totalorder %s157_s0, %s157_s0 }
  0x62   :  { %p3144_p7 = scmp.ne.s32.totalorder %s157_s0, %s3143_s25  ;;  %p3149_p9 = scmp.lt.s32.totalorder %s3143_s25, %s3143_s25 }
  0x64   :  { %p3150_p10 = por %p3149_p9, %p3148_p8 }
  0x66   :  { %p3151_p11 = pnand %p3150_p10, %p3144_p7 }
  0x68   :  { %3154 = shalt.err (!%p3151_p11)
}
  0x69   :  { %162 = dma.hbm_to_vmem [thread:$0]  %s4264_s15, 1024, %s157_s0, [#allocation18], %s4286_s20, %s4286_s20, %s3325_s27  }
  0x6a   :  { %s3334_s18 = smov [#allocation2]   ;;  %s3335_s2 = smov [#allocation7]  }
  0x6b   :  { %s36_s9 = sshll.u32 %s3334_s18, 4  ;;  %s60_s30 = sshll.u32 %s3335_s2, 4  ;;  %s37_s9 = int_to_ptr.vmem [resolvable:$true] %s36_s9  ;;  %s61_s30 = int_to_ptr.vmem [resolvable:$true] %s60_s30 }
  0x6c   :  { %s4287_s19 = sld [smem:[#allocation28_spill]] }
  0x72   :  { %s3155_s22 = scalar_lea.hbm %s4287_s19, 256 }
  0x73   :  { %p3156_p12 = scmp.ne.s32.totalorder %s4287_s19, %s3155_s22  ;;  %p3159_p13 = scmp.lt.u32.totalorder %s3155_s22, %s4287_s19 }
  0x75   :  { %p3161_p0 = pnand %p3159_p13, %p3156_p12 }
  0x77   :  { %3164 = shalt.err (!%p3161_p0)
}
  0x78   :  { %s3165_s15 = scalar_lea.vmem %s37_s9, 256  ;;  %p3170_p2 = scmp.lt.s32.totalorder %s37_s9, %s37_s9 }
  0x79   :  { %p3166_p1 = scmp.ne.s32.totalorder %s37_s9, %s3165_s15  ;;  %p3171_p3 = scmp.lt.s32.totalorder %s3165_s15, %s3165_s15 }
  0x7b   :  { %p3172_p4 = por %p3171_p3, %p3170_p2 }
  0x7d   :  { %p3173_p5 = pnand %p3172_p4, %p3166_p1 }
  0x7f   :  { %3176 = shalt.err (!%p3173_p5)
}
  0x80   :  { %42 = dma.hbm_to_vmem [thread:$0]  %s4287_s19, 256, %s37_s9, [#allocation3], %s3332_s21, %s3332_s21, %s3333_s3  }
  0x81   :  { %s4288_s2 = sld [smem:[#allocation30_spill]] }
  0x87   :  { %s3177_s1 = scalar_lea.hbm %s4288_s2, 256 }
  0x88   :  { %p3178_p6 = scmp.ne.s32.totalorder %s4288_s2, %s3177_s1  ;;  %p3181_p7 = scmp.lt.u32.totalorder %s3177_s1, %s4288_s2 }
  0x8a   :  { %p3183_p8 = pnand %p3181_p7, %p3178_p6 }
  0x8c   :  { %3186 = shalt.err (!%p3183_p8)
}
  0x8d   :  { %s3187_s24 = scalar_lea.vmem %s61_s30, 256  ;;  %p3192_p10 = scmp.lt.s32.totalorder %s61_s30, %s61_s30 }
  0x8e   :  { %p3188_p9 = scmp.ne.s32.totalorder %s61_s30, %s3187_s24  ;;  %p3193_p11 = scmp.lt.s32.totalorder %s3187_s24, %s3187_s24 }
  0x90   :  { %p3194_p12 = por %p3193_p11, %p3192_p10 }
  0x92   :  { %p3195_p13 = pnand %p3194_p12, %p3188_p9 }
  0x94   :  { %3198 = shalt.err (!%p3195_p13)
}
  0x95   :  { %66 = dma.hbm_to_vmem [thread:$0]  %s4288_s2, 256, %s61_s30, [#allocation6], %s3332_s21, %s3332_s21, %s3333_s3  }
  0x96   :  { %s3336_s25 = smov [#allocation10]   ;;  %s3337_s0 = smov [#allocation13]  }
  0x97   :  { %s90_s15 = sshll.u32 %s3336_s25, 4  ;;  %s118_s12 = sshll.u32 %s3337_s0, 4  ;;  %s91_s15 = int_to_ptr.vmem [resolvable:$true] %s90_s15  ;;  %s119_s12 = int_to_ptr.vmem [resolvable:$true] %s118_s12 }
  0x98   :  { %s3199_s1 = scalar_lea.hbm %s4256_s7, 2048 }
  0x99   :  { %p3200_p0 = scmp.ne.s32.totalorder %s4256_s7, %s3199_s1  ;;  %p3203_p1 = scmp.lt.u32.totalorder %s3199_s1, %s4256_s7 }
  0x9b   :  { %p3205_p2 = pnand %p3203_p1, %p3200_p0 }
  0x9d   :  { %3208 = shalt.err (!%p3205_p2)
}
  0x9e   :  { %s3209_s30 = scalar_lea.vmem %s91_s15, 2048  ;;  %p3214_p4 = scmp.lt.s32.totalorder %s91_s15, %s91_s15 }
  0x9f   :  { %p3210_p3 = scmp.ne.s32.totalorder %s91_s15, %s3209_s30  ;;  %p3215_p5 = scmp.lt.s32.totalorder %s3209_s30, %s3209_s30 }
  0xa1   :  { %p3216_p6 = por %p3215_p5, %p3214_p4 }
  0xa3   :  { %p3217_p7 = pnand %p3216_p6, %p3210_p3 }
  0xa5   :  { %3220 = shalt.err (!%p3217_p7)
}
  0xa6   :  { %96 = dma.hbm_to_vmem [thread:$0]  %s4256_s7, 2048, %s91_s15, [#allocation9], %s4286_s20, %s4286_s20, %s3325_s27  }
  0xa7   :  { %s3221_s25 = scalar_lea.hbm %s4260_s11, 1024 }
  0xa8   :  { %p3222_p8 = scmp.ne.s32.totalorder %s4260_s11, %s3221_s25  ;;  %p3225_p9 = scmp.lt.u32.totalorder %s3221_s25, %s4260_s11 }
  0xaa   :  { %p3227_p10 = pnand %p3225_p9, %p3222_p8 }
  0xac   :  { %3230 = shalt.err (!%p3227_p10)
}
  0xad   :  { %s3231_s29 = scalar_lea.vmem %s119_s12, 1024  ;;  %p3236_p12 = scmp.lt.s32.totalorder %s119_s12, %s119_s12 }
  0xae   :  { %p3232_p11 = scmp.ne.s32.totalorder %s119_s12, %s3231_s29  ;;  %p3237_p13 = scmp.lt.s32.totalorder %s3231_s29, %s3231_s29 }
  0xb0   :  { %p3238_p0 = por %p3237_p13, %p3236_p12 }
  0xb2   :  { %p3239_p1 = pnand %p3238_p0, %p3232_p11 }
  0xb4   :  { %3242 = shalt.err (!%p3239_p1)
}
  0xb5   :  { %124 = dma.hbm_to_vmem [thread:$0]  %s4260_s11, 1024, %s119_s12, [#allocation12], %s4286_s20, %s4286_s20, %s3325_s27  }
  0xb6   :  { %s3338_s22 = smov [#allocation16]   ;;  %s3339_s26 = smov [#allocation19]  }
  0xb7   :  { %s142_s23 = sshll.u32 %s3338_s22, 4  ;;  %s170_s30 = sshll.u32 %s3339_s26, 4  ;;  %s143_s23 = int_to_ptr.vmem [resolvable:$true] %s142_s23  ;;  %s171_s30 = int_to_ptr.vmem [resolvable:$true] %s170_s30 }
  0xb8   :  { %s3243_s9 = scalar_lea.hbm %s4262_s13, 1024 }
  0xb9   :  { %p3244_p2 = scmp.ne.s32.totalorder %s4262_s13, %s3243_s9  ;;  %p3247_p3 = scmp.lt.u32.totalorder %s3243_s9, %s4262_s13 }
  0xbb   :  { %p3249_p4 = pnand %p3247_p3, %p3244_p2 }
  0xbd   :  { %3252 = shalt.err (!%p3249_p4)
}
  0xbe   :  { %s3253_s11 = scalar_lea.vmem %s143_s23, 1024  ;;  %p3258_p6 = scmp.lt.s32.totalorder %s143_s23, %s143_s23 }
  0xbf   :  { %p3254_p5 = scmp.ne.s32.totalorder %s143_s23, %s3253_s11  ;;  %p3259_p7 = scmp.lt.s32.totalorder %s3253_s11, %s3253_s11 }
  0xc1   :  { %p3260_p8 = por %p3259_p7, %p3258_p6 }
  0xc3   :  { %p3261_p9 = pnand %p3260_p8, %p3254_p5 }
  0xc5   :  { %3264 = shalt.err (!%p3261_p9)
}
  0xc6   :  { %148 = dma.hbm_to_vmem [thread:$0]  %s4262_s13, 1024, %s143_s23, [#allocation15], %s4286_s20, %s4286_s20, %s3325_s27  }
  0xc7   :  { %s3265_s7 = scalar_lea.hbm %s4266_s17, 1024 }
  0xc8   :  { %p3266_p10 = scmp.ne.s32.totalorder %s4266_s17, %s3265_s7  ;;  %p3269_p11 = scmp.lt.u32.totalorder %s3265_s7, %s4266_s17 }
  0xca   :  { %p3271_p12 = pnand %p3269_p11, %p3266_p10 }
  0xcc   :  { %3274 = shalt.err (!%p3271_p12)
}
  0xcd   :  { %s3275_s24 = scalar_lea.vmem %s171_s30, 1024  ;;  %p3280_p0 = scmp.lt.s32.totalorder %s171_s30, %s171_s30 }
  0xce   :  { %p3276_p13 = scmp.ne.s32.totalorder %s171_s30, %s3275_s24  ;;  %p3281_p1 = scmp.lt.s32.totalorder %s3275_s24, %s3275_s24 }
  0xd0   :  { %p3282_p2 = por %p3281_p1, %p3280_p0 }
  0xd2   :  { %p3283_p3 = pnand %p3282_p2, %p3276_p13 }
  0xd4   :  { %3286 = shalt.err (!%p3283_p3)
}
  0xd5   :  { %176 = dma.hbm_to_vmem [thread:$0]  %s4266_s17, 1024, %s171_s30, [#allocation18], %s4286_s20, %s4286_s20, %s3325_s27  }
  0xd6   :  { %3309 = dma.done.wait [#allocation3], 256  }
  0xd7   :  { %3310 = vsyncadd [#allocation3], 4294967040 }
  0xd8   :  { %3311 = dma.done.wait [#allocation6], 512  }
  0xd9   :  { %3312 = vsyncadd [#allocation6], 4294966784 }
  0xda   :  { %3313 = dma.done.wait [#allocation9], 2560  }
  0xdb   :  { %3314 = vsyncadd [#allocation9], 4294964736 }
  0xdc   :  { %3315 = dma.done.wait [#allocation12], 2048  }
  0xdd   :  { %3316 = vsyncadd [#allocation12], 4294965248 }
  0xde   :  { %3317 = dma.done.wait [#allocation15], 3072  }
  0xdf   :  { %3318 = vsyncadd [#allocation15], 4294964224 }
  0xe0   :  { %3319 = dma.done.wait [#allocation18], 2048  }
  0xe1   :  { %3320 = vsyncadd [#allocation18], 4294965248  ;;  %v4276_v0 = vmov 0.0   ;;  %vm3341_vm0 = vmmov 0   ;;  %v3342_v1 = vmov 0   ;;  %v3685_v25 = vld [vmem:[#allocation2] sm:$0xff] }
  0xe2   :  { %2674 = vmatprep.subr.bf16.mxu1 %v4276_v0  ;;  %2690 = vmatprep.mubr.msk.bf16.mxu1 %vm3341_vm0, %v4276_v0  ;;  %v2875_v2 = vld [vmem:[%s4257_s8 + $0x4] ss:$12 sps:$4 sm:$0xff]   ;;  %v2877_v3 = vld [vmem:[%s4257_s8 + $0x8] ss:$12 sps:$4 sm:$0xff]   ;;  %v2878_v4 = vld [vmem:[%s4257_s8] ss:$12 sps:$4 sm:$0xff]  }
  0xe3   :  { %412 = vmatprep.mubr.bf16.mxu0 %v3342_v1  ;;  %380 = vmatprep.subr.bf16.mxu0 %v2875_v2  ;;  %v2879_v5 = vld [vmem:[%s4257_s8 + $0x1c] ss:$12 sps:$4 sm:$0xff]   ;;  %v2881_v6 = vld [vmem:[%s4257_s8 + $0x20] ss:$12 sps:$4 sm:$0xff]   ;;  %v2882_v7 = vld [vmem:[%s4257_s8 + $0x18] ss:$12 sps:$4 sm:$0xff]  }
  0xe4   :  { %2675 = vmatpush3.bf16.msra.mxu1 %v2877_v3  ;;  %381 = vmatpush1.bf16.msra.mxu0 %v2878_v4  ;;  %v2883_v8 = vld [vmem:[%s4257_s8 + $0x34] ss:$12 sps:$4 sm:$0xff]   ;;  %v2885_v9 = vld [vmem:[%s4257_s8 + $0x38] ss:$12 sps:$4 sm:$0xff]   ;;  %v2886_v10 = vld [vmem:[%s4257_s8 + $0x30] ss:$12 sps:$4 sm:$0xff]  }
  0xe5   :  { %2676 = vmatprep.subr.bf16.mxu1 %v4276_v0  ;;  %382 = vmatprep.subr.bf16.mxu0 %v2879_v5  ;;  %v2887_v11 = vld [vmem:[%s4257_s8 + $0x4c] ss:$12 sps:$4 sm:$0xff]   ;;  %v2889_v12 = vld [vmem:[%s4257_s8 + $0x50] ss:$12 sps:$4 sm:$0xff]   ;;  %v2890_v13 = vld [vmem:[%s4257_s8 + $0x48] ss:$12 sps:$4 sm:$0xff]  }
  0xe6   :  { %v2891_v14 = vld [vmem:[%s4257_s8 + $0x64] ss:$12 sps:$4 sm:$0xff]   ;;  %v2893_v15 = vld [vmem:[%s4257_s8 + $0x68] ss:$12 sps:$4 sm:$0xff]   ;;  %v2894_v16 = vld [vmem:[%s4257_s8 + $0x60] ss:$12 sps:$4 sm:$0xff]  }
  0xe7   :  { %v2895_v17 = vld [vmem:[%s4257_s8 + $0x7c] ss:$12 sps:$4 sm:$0xff]   ;;  %v2897_v18 = vld [vmem:[%s4257_s8 + $0x80] ss:$12 sps:$4 sm:$0xff]   ;;  %v2898_v19 = vld [vmem:[%s4257_s8 + $0x78] ss:$12 sps:$4 sm:$0xff]  }
  0xe8   :  { %2677 = vmatpush3.bf16.msra.mxu1 %v2881_v6  ;;  %383 = vmatpush1.bf16.msra.mxu0 %v2882_v7  ;;  %v2899_v20 = vld [vmem:[%s4257_s8 + $0x94] ss:$12 sps:$4 sm:$0xff]   ;;  %v2901_v21 = vld [vmem:[%s4257_s8 + $0x98] ss:$12 sps:$4 sm:$0xff]   ;;  %v2902_v22 = vld [vmem:[%s4257_s8 + $0x90] ss:$12 sps:$4 sm:$0xff]  }
  0xe9   :  { %2678 = vmatprep.subr.bf16.mxu1 %v4276_v0  ;;  %384 = vmatprep.subr.bf16.mxu0 %v2883_v8  ;;  %v2903_v23 = vld [vmem:[%s4257_s8 + $0xac] ss:$12 sps:$4 sm:$0xff]   ;;  %v2905_v24 = vld [vmem:[%s4257_s8 + $0xb0] ss:$12 sps:$4 sm:$0xff]   ;;  %v2906_v27 = vld [vmem:[%s4257_s8 + $0xa8] ss:$12 sps:$4 sm:$0xff]  }
  0xea   :  { %v3687_v26 = vld [vmem:[#allocation2 + $0x8] sm:$0xff]  ;;  %v2907_v40 = vld [vmem:[%s4253_s4] sm:$0xff]   ;;  %vm539_vm1 = vcmask 130048   ;;  %v2909_v42 = vld [vmem:[%s4253_s4 + $0x10] sm:$0xff]   ;;  %vm1428_vm2 = vcmask 261120   ;;  %s3343_s23 = smov [#allocation20]  }
  0xeb   :  { %v215_v28 = vpack.c.bf16 %v3687_v26, %v3685_v25  ;;  %v2908_v41 = vld [vmem:[%s4253_s4 + $0x8] sm:$0xff]   ;;  %v2910_v43 = vld [vmem:[%s4253_s4 + $0x18] sm:$0xff]   ;;  %v2911_v44 = vld [vmem:[%s4253_s4 + $0x20] sm:$0xff]  }
  0xec   :  { %2679 = vmatpush3.bf16.msra.mxu1 %v2885_v9  ;;  %385 = vmatpush1.bf16.msra.mxu0 %v2886_v10  ;;  %v2912_v45 = vld [vmem:[%s4253_s4 + $0x28] sm:$0xff]   ;;  %v2913_v46 = vld [vmem:[%s4253_s4 + $0x30] sm:$0xff]   ;;  %v2914_v47 = vld [vmem:[%s4253_s4 + $0x38] sm:$0xff]   ;;  %s4301_s4 = sld [smem:[#allocation32_spill]] }
  0xed   :  { %2680 = vmatprep.subr.bf16.mxu1 %v4276_v0  ;;  %386 = vmatprep.subr.bf16.mxu0 %v2887_v11  ;;  %v3750_v50 = vld [vmem:[%s4254_s5] sm:$0xff]   ;;  %v3758_v59 = vld [vmem:[%s4254_s5 + $0x8] sm:$0xff]   ;;  %v3767_v6 = vld [vmem:[%s4254_s5 + $0x10] sm:$0xff]  }
  0xf0   :  { %2681 = vmatpush3.bf16.msra.mxu1 %v2889_v12  ;;  %387 = vmatpush1.bf16.msra.mxu0 %v2890_v13 }
  0xf1   :  { %2682 = vmatprep.subr.bf16.mxu1 %v4276_v0  ;;  %388 = vmatprep.subr.bf16.mxu0 %v2891_v14 }
  0xf4   :  { %2683 = vmatpush3.bf16.msra.mxu1 %v2893_v15  ;;  %389 = vmatpush1.bf16.msra.mxu0 %v2894_v16  ;;  %v3776_v15 = vld [vmem:[%s4254_s5 + $0x18] sm:$0xff]  }
  0xf5   :  { %2684 = vmatprep.subr.bf16.mxu1 %v4276_v0  ;;  %390 = vmatprep.subr.bf16.mxu0 %v2895_v17 }
  0xf8   :  { %2685 = vmatpush3.bf16.msra.mxu1 %v2897_v18  ;;  %391 = vmatpush1.bf16.msra.mxu0 %v2898_v19 }
  0xf9   :  { %2686 = vmatprep.subr.bf16.mxu1 %v4276_v0  ;;  %392 = vmatprep.subr.bf16.mxu0 %v2899_v20 }
  0xfc   :  { %2687 = vmatpush3.bf16.msra.mxu1 %v2901_v21  ;;  %393 = vmatpush1.bf16.msra.mxu0 %v2902_v22 }
  0xfd   :  { %2688 = vmatprep.subr.bf16.mxu1 %v4276_v0  ;;  %394 = vmatprep.subr.bf16.mxu0 %v2903_v23 }
 0x100   :  { %2689 = vmatpush3.bf16.msra.mxu1 %v2905_v24  ;;  %395 = vmatpush1.bf16.msra.mxu0 %v2906_v27  ;;  %v2919_v24 = vld [vmem:[%s4254_s5 + $0x20] sm:$0xff]  }
 0x101   :  { %2694 = vmatprep.subr.bf16.mxu1 %v4276_v0 }
 0x103   :  { %2691 = vmatmul.mubr.bf16.vlgmr.msra.gmra.mrb[0].mxu1 %v215_v28  ;;  %413 = vmatmul.mubr.bf16.vlgmr.msra.gmra.mrb[0].mxu0 %v215_v28 }
 0x104   :  { %2710 = vmatprep.mubr.msk.bf16.mxu1 %vm3341_vm0, %v4276_v0  ;;  %596 = vmatprep.mubr.bf16.mxu0 %v3342_v1 }
 0x1d6   :  { %v457_v29 = vpop.f32.mrb[0].mxu1  ;;  %v3699_v30 = vpop.f32.mrb[0].mxu0 }
 0x1d7   :  { %v2692_v31 = vpop.f32.mrb[1].mxu1  ;;  %v416_v32 = vpop.f32.mrb[1].mxu0 }
 0x1d8   :  { %v460_v33 = vpop.f32.mrb[2].mxu1  ;;  %v3701_v35 = vpop.f32.mrb[2].mxu0 }
 0x1d9   :  { %v466_v34 = vpack.c.bf16 %v460_v33, %v457_v29  ;;  %v2693_v36 = vpop.f32.mrb[3].mxu1  ;;  %v464_v37 = vpack.c.bf16 %v3701_v35, %v3699_v30  ;;  %v420_v38 = vpop.f32.mrb[3].mxu0  ;;  %v757_v30 = vld [vmem:[#allocation7] sm:$0xff] }
 0x1da   :  { %v465_v39 = vpack.c.bf16 %v420_v38, %v416_v32  ;;  %v2920_v38 = vld [vmem:[%s4254_s5 + $0x28] sm:$0xff]  }
 0x1db   :  { %564 = vmatprep.subr.bf16.mxu0 %v466_v34 }
 0x1dc   :  { %565 = vmatpush1.bf16.msra.mxu0 %v465_v39 }
 0x1dd   :  { %2714 = vmatprep.subr.bf16.mxu0 %v4276_v0 }
 0x1df   :  { %2405 = vmatmul.mubr.msk.bf16.vlgmr.msra.gmra.mrb[4].mxu0 %vm539_vm1, %v2907_v40 }
 0x1e0   :  { %606 = vmatprep.mubr.bf16.mxu0 %v3342_v1 }
 0x1e7   :  { %2406 = vmatmul.mubr.msk.bf16.gmra.mrb[8].mxu0 %vm539_vm1, %v2908_v41 }
 0x1e8   :  { %616 = vmatprep.mubr.bf16.mxu0 %v3342_v1 }
 0x1ef   :  { %2407 = vmatmul.mubr.msk.bf16.gmra.mrb[12].mxu0 %vm539_vm1, %v2909_v42 }
 0x1f0   :  { %626 = vmatprep.mubr.bf16.mxu0 %v3342_v1 }
 0x1f7   :  { %2408 = vmatmul.mubr.msk.bf16.gmra.mrb[16].mxu0 %vm539_vm1, %v2910_v43 }
 0x1f8   :  { %636 = vmatprep.mubr.bf16.mxu0 %v3342_v1 }
 0x1ff   :  { %2409 = vmatmul.mubr.msk.bf16.gmra.mrb[20].mxu0 %vm539_vm1, %v2911_v44 }
 0x200   :  { %646 = vmatprep.mubr.bf16.mxu0 %v3342_v1 }
 0x207   :  { %2410 = vmatmul.mubr.msk.bf16.gmra.mrb[24].mxu0 %vm539_vm1, %v2912_v45 }
 0x208   :  { %656 = vmatprep.mubr.bf16.mxu0 %v3342_v1 }
 0x20f   :  { %2411 = vmatmul.mubr.msk.bf16.gmra.mrb[28].mxu0 %vm539_vm1, %v2913_v46 }
 0x210   :  { %666 = vmatprep.mubr.bf16.mxu0 %v3342_v1 }
 0x217   :  { %2412 = vmatmul.mubr.msk.bf16.gmra.mrb[32].mxu0 %vm539_vm1, %v2914_v47  ;;  %v2921_v47 = vld [vmem:[%s4254_s5 + $0x30] sm:$0xff]  }
 0x218   :  { %2730 = vmatprep.mubr.msk.bf16.mxu0 %vm3341_vm0, %v4276_v0 }
 0x2b2   :  { %v598_v48 = vpop.f32.mrb[4].mxu0 }
 0x2b3   :  { %v600_v49 = vpop.f32.mrb[5].mxu0 }
 0x2b4   :  { %v602_v51 = vpop.f32.mrb[6].mxu0 }
 0x2b5   :  { %v677_v52 = vpack.c.bf16 %v602_v51, %v598_v48  ;;  %v604_v53 = vpop.f32.mrb[7].mxu0 }
 0x2b6   :  { %v678_v54 = vpack.c.bf16 %v604_v53, %v600_v49 }
 0x2b7   :  { %v741_v55 = vmul.bf16 %v3750_v50, %v677_v52 }
 0x2b8   :  { %v749_v56 = vmul.bf16 %v3750_v50, %v678_v54 }
 0x2b9   :  { %2695 = vmatpush3.bf16.xpose.msra.mxu1 %v741_v55 }
 0x2ba   :  { %v608_v57 = vpop.f32.mrb[8].mxu0  ;;  %2715 = vmatpush3.bf16.msra.mxu0 %v749_v56  ;;  %2696 = vmatprep.subr.bf16.mxu1 %v4276_v0 }
 0x2bb   :  { %v610_v58 = vpop.f32.mrb[9].mxu0  ;;  %2716 = vmatprep.subr.bf16.mxu0 %v4276_v0 }
 0x2bc   :  { %v612_v60 = vpop.f32.mrb[10].mxu0 }
 0x2bd   :  { %v679_v61 = vpack.c.bf16 %v612_v60, %v608_v57  ;;  %v614_v62 = vpop.f32.mrb[11].mxu0  ;;  %v2922_v57 = vld [vmem:[%s4254_s5 + $0x38] sm:$0xff]  }
 0x2be   :  { %v680_v63 = vpack.c.bf16 %v614_v62, %v610_v58 }
 0x2bf   :  { %v742_v2 = vmul.bf16 %v3758_v59, %v679_v61 }
 0x2c0   :  { %v750_v3 = vmul.bf16 %v3758_v59, %v680_v63 }
 0x2c1   :  { %2697 = vmatpush3.bf16.xpose.msra.mxu1 %v742_v2 }
 0x2c2   :  { %v618_v4 = vpop.f32.mrb[12].mxu0  ;;  %2717 = vmatpush3.bf16.msra.mxu0 %v750_v3  ;;  %2698 = vmatprep.subr.bf16.mxu1 %v4276_v0 }
 0x2c3   :  { %v620_v5 = vpop.f32.mrb[13].mxu0  ;;  %2718 = vmatprep.subr.bf16.mxu0 %v4276_v0 }
 0x2c4   :  { %v622_v7 = vpop.f32.mrb[14].mxu0 }
 0x2c5   :  { %v681_v8 = vpack.c.bf16 %v622_v7, %v618_v4  ;;  %v624_v9 = vpop.f32.mrb[15].mxu0 }
 0x2c6   :  { %v682_v10 = vpack.c.bf16 %v624_v9, %v620_v5 }
 0x2c7   :  { %v743_v11 = vmul.bf16 %v3767_v6, %v681_v8 }
 0x2c8   :  { %v751_v12 = vmul.bf16 %v3767_v6, %v682_v10 }
 0x2c9   :  { %2699 = vmatpush3.bf16.xpose.msra.mxu1 %v743_v11 }
 0x2ca   :  { %v628_v13 = vpop.f32.mrb[16].mxu0  ;;  %2719 = vmatpush3.bf16.msra.mxu0 %v751_v12  ;;  %2700 = vmatprep.subr.bf16.mxu1 %v4276_v0 }
 0x2cb   :  { %v630_v14 = vpop.f32.mrb[17].mxu0  ;;  %2720 = vmatprep.subr.bf16.mxu0 %v4276_v0 }
 0x2cc   :  { %v632_v16 = vpop.f32.mrb[18].mxu0 }
 0x2cd   :  { %v683_v17 = vpack.c.bf16 %v632_v16, %v628_v13  ;;  %v634_v18 = vpop.f32.mrb[19].mxu0  ;;  %v2924_v16 = vld [vmem:[#allocation11 + $0x8] sm:$0xff]  }
 0x2ce   :  { %v684_v19 = vpack.c.bf16 %v634_v18, %v630_v14  ;;  %v2923_v14 = vld [vmem:[#allocation11] sm:$0xff]   ;;  %v2926_v18 = vld [vmem:[#allocation11 + $0x18] sm:$0xff]  }
 0x2cf   :  { %v744_v20 = vmul.bf16 %v3776_v15, %v683_v17  ;;  %v2925_v17 = vld [vmem:[#allocation11 + $0x10] sm:$0xff]  }
 0x2d0   :  { %v752_v21 = vmul.bf16 %v3776_v15, %v684_v19  ;;  %v2927_v19 = vld [vmem:[#allocation11 + $0x20] sm:$0xff]  }
 0x2d1   :  { %2701 = vmatpush3.bf16.xpose.msra.mxu1 %v744_v20  ;;  %v2928_v20 = vld [vmem:[#allocation11 + $0x28] sm:$0xff]  }
 0x2d2   :  { %v638_v22 = vpop.f32.mrb[20].mxu0  ;;  %2721 = vmatpush3.bf16.msra.mxu0 %v752_v21  ;;  %2702 = vmatprep.subr.bf16.mxu1 %v4276_v0  ;;  %v2929_v21 = vld [vmem:[#allocation11 + $0x30] sm:$0xff]  }
 0x2d3   :  { %v640_v23 = vpop.f32.mrb[21].mxu0  ;;  %2722 = vmatprep.subr.bf16.mxu0 %v4276_v0 }
 0x2d4   :  { %v642_v27 = vpop.f32.mrb[22].mxu0 }
 0x2d5   :  { %v685_v28 = vpack.c.bf16 %v642_v27, %v638_v22  ;;  %v644_v29 = vpop.f32.mrb[23].mxu0  ;;  %v2930_v22 = vld [vmem:[#allocation11 + $0x38] sm:$0xff]   ;;  %v2958_v27 = vld [vmem:[#allocation13 + $0x8] sm:$0xff]  }
 0x2d6   :  { %v686_v31 = vpack.c.bf16 %v644_v29, %v640_v23  ;;  %v2933_v23 = vld [vmem:[#allocation14 + $0x4] ss:$8 sps:$4 sm:$0xff]   ;;  %v2960_v29 = vld [vmem:[#allocation13 + $0x18] sm:$0xff]  }
 0x2d7   :  { %v745_v32 = vmul.bf16 %v2919_v24, %v685_v28  ;;  %v2959_v28 = vld [vmem:[#allocation13 + $0x10] sm:$0xff]  }
 0x2d8   :  { %v753_v33 = vmul.bf16 %v2919_v24, %v686_v31  ;;  %v2961_v31 = vld [vmem:[#allocation13 + $0x20] sm:$0xff]  }
 0x2d9   :  { %2703 = vmatpush3.bf16.xpose.msra.mxu1 %v745_v32  ;;  %v2962_v32 = vld [vmem:[#allocation13 + $0x28] sm:$0xff]  }
 0x2da   :  { %v648_v34 = vpop.f32.mrb[24].mxu0  ;;  %2723 = vmatpush3.bf16.msra.mxu0 %v753_v33  ;;  %2704 = vmatprep.subr.bf16.mxu1 %v4276_v0 }
 0x2db   :  { %v650_v36 = vpop.f32.mrb[25].mxu0  ;;  %2724 = vmatprep.subr.bf16.mxu0 %v4276_v0 }
 0x2dc   :  { %v652_v39 = vpop.f32.mrb[26].mxu0 }
 0x2dd   :  { %v687_v40 = vpack.c.bf16 %v652_v39, %v648_v34  ;;  %v654_v41 = vpop.f32.mrb[27].mxu0 }
 0x2de   :  { %v688_v42 = vpack.c.bf16 %v654_v41, %v650_v36 }
 0x2df   :  { %v746_v43 = vmul.bf16 %v2920_v38, %v687_v40 }
 0x2e0   :  { %v754_v44 = vmul.bf16 %v2920_v38, %v688_v42 }
 0x2e1   :  { %2705 = vmatpush3.bf16.xpose.msra.mxu1 %v746_v43 }
 0x2e2   :  { %v658_v45 = vpop.f32.mrb[28].mxu0  ;;  %2725 = vmatpush3.bf16.msra.mxu0 %v754_v44  ;;  %2706 = vmatprep.subr.bf16.mxu1 %v4276_v0 }
 0x2e3   :  { %v660_v46 = vpop.f32.mrb[29].mxu0  ;;  %2726 = vmatprep.subr.bf16.mxu0 %v4276_v0 }
 0x2e4   :  { %v662_v48 = vpop.f32.mrb[30].mxu0 }
 0x2e5   :  { %v689_v49 = vpack.c.bf16 %v662_v48, %v658_v45  ;;  %v664_v51 = vpop.f32.mrb[31].mxu0 }
 0x2e6   :  { %v690_v52 = vpack.c.bf16 %v664_v51, %v660_v46  ;;  %v2934_v51 = vld [vmem:[#allocation14 + $0x10] ss:$8 sps:$4 sm:$0xff]  }
 0x2e7   :  { %v747_v53 = vmul.bf16 %v2921_v47, %v689_v49  ;;  %v2936_v49 = vld [vmem:[#allocation14 + $0x14] ss:$8 sps:$4 sm:$0xff]  }
 0x2e8   :  { %v755_v54 = vmul.bf16 %v2921_v47, %v690_v52  ;;  %v2939_v52 = vld [vmem:[#allocation14 + $0x24] ss:$8 sps:$4 sm:$0xff]  }
 0x2e9   :  { %2707 = vmatpush3.bf16.xpose.msra.mxu1 %v747_v53  ;;  %v2937_v53 = vld [vmem:[#allocation14 + $0x20] ss:$8 sps:$4 sm:$0xff]  }
 0x2ea   :  { %v668_v55 = vpop.f32.mrb[32].mxu0  ;;  %2727 = vmatpush3.bf16.msra.mxu0 %v755_v54  ;;  %2708 = vmatprep.subr.bf16.mxu1 %v4276_v0  ;;  %v2942_v54 = vld [vmem:[#allocation14 + $0x34] ss:$8 sps:$4 sm:$0xff]  }
 0x2eb   :  { %v670_v56 = vpop.f32.mrb[33].mxu0  ;;  %2728 = vmatprep.subr.bf16.mxu0 %v4276_v0 }
 0x2ec   :  { %v672_v58 = vpop.f32.mrb[34].mxu0 }
 0x2ed   :  { %v691_v60 = vpack.c.bf16 %v672_v58, %v668_v55  ;;  %v674_v61 = vpop.f32.mrb[35].mxu0  ;;  %v2940_v55 = vld [vmem:[#allocation14 + $0x30] ss:$8 sps:$4 sm:$0xff]   ;;  %v2948_v58 = vld [vmem:[#allocation14 + $0x54] ss:$8 sps:$4 sm:$0xff]  }
 0x2ee   :  { %v692_v62 = vpack.c.bf16 %v674_v61, %v670_v56  ;;  %v2945_v56 = vld [vmem:[#allocation14 + $0x44] ss:$8 sps:$4 sm:$0xff]  }
 0x2ef   :  { %v748_v63 = vmul.bf16 %v2922_v57, %v691_v60  ;;  %v2946_v60 = vld [vmem:[#allocation14 + $0x50] ss:$8 sps:$4 sm:$0xff]   ;;  %v2951_v61 = vld [vmem:[#allocation14 + $0x64] ss:$8 sps:$4 sm:$0xff]  }
 0x2f0   :  { %v756_v2 = vmul.bf16 %v2922_v57, %v692_v62  ;;  %v2949_v62 = vld [vmem:[#allocation14 + $0x60] ss:$8 sps:$4 sm:$0xff]  }
 0x2f1   :  { %2709 = vmatpush3.bf16.xpose.msra.mxu1 %v748_v63  ;;  %v2954_v63 = vld [vmem:[#allocation14 + $0x74] ss:$8 sps:$4 sm:$0xff]  }
 0x2f2   :  { %2729 = vmatpush3.bf16.msra.mxu0 %v756_v2  ;;  %2734 = vmatprep.subr.bf16.mxu1 %v4276_v0  ;;  %v2952_v2 = vld [vmem:[#allocation14 + $0x70] ss:$8 sps:$4 sm:$0xff]  }
 0x2f3   :  { %2754 = vmatprep.subr.bf16.mxu0 %v4276_v0 }
 0x2f8   :  { %2711 = vmatmul.mubr.bf16.vlgmr.msra.gmra.mrb[4].mxu1 %v464_v37 }
 0x2f9   :  { %2735 = vmatpush3.bf16.msra.mxu1 %v3750_v50  ;;  %2750 = vmatprep.mubr.msk.bf16.mxu1 %vm3341_vm0, %v4276_v0 }
 0x2fa   :  { %2736 = vmatprep.subr.bf16.mxu1 %v4276_v0 }
 0x2fd   :  { %2737 = vmatpush3.bf16.msra.mxu1 %v3758_v59  ;;  %v758_v59 = vld [vmem:[#allocation7 + $0x8] sm:$0xff] }
 0x2fe   :  { %2738 = vmatprep.subr.bf16.mxu1 %v4276_v0 }
 0x301   :  { %2739 = vmatpush3.bf16.msra.mxu1 %v3767_v6 }
 0x302   :  { %2740 = vmatprep.subr.bf16.mxu1 %v4276_v0 }
 0x305   :  { %2741 = vmatpush3.bf16.msra.mxu1 %v3776_v15 }
 0x306   :  { %2742 = vmatprep.subr.bf16.mxu1 %v4276_v0 }
 0x309   :  { %2743 = vmatpush3.bf16.msra.mxu1 %v2919_v24  ;;  %v2957_v24 = vld [vmem:[#allocation13] sm:$0xff]  }
 0x30a   :  { %2744 = vmatprep.subr.bf16.mxu1 %v4276_v0 }
 0x30d   :  { %2745 = vmatpush3.bf16.msra.mxu1 %v2920_v38 }
 0x30e   :  { %2746 = vmatprep.subr.bf16.mxu1 %v4276_v0 }
 0x311   :  { %2747 = vmatpush3.bf16.msra.mxu1 %v2921_v47  ;;  %v2931_v47 = vld [vmem:[#allocation14] ss:$8 sps:$4 sm:$0xff]  }
 0x312   :  { %2748 = vmatprep.subr.bf16.mxu1 %v4276_v0 }
 0x315   :  { %2749 = vmatpush3.bf16.msra.mxu1 %v2922_v57  ;;  %v2943_v57 = vld [vmem:[#allocation14 + $0x40] ss:$8 sps:$4 sm:$0xff]  }
 0x316   :  { %2774 = vmatprep.subr.bf16.mxu1 %v4276_v0 }
 0x3cb   :  { %v793_v35 = vpop.f32.mrb[4].mxu1 }
 0x3cc   :  { %v794_v37 = vadd.f32 %v793_v35, %v757_v30  ;;  %v2712_v50 = vpop.f32.mrb[5].mxu1  ;;  %v2955_v30 = vld [vmem:[#allocation5] sm:$0xff]   ;;  %v2956_v35 = vld [vmem:[#allocation5 + $0x8] sm:$0xff]  }
 0x3cd   :  { %v796_v3 = vpop.f32.mrb[6].mxu1  ;;  %v2964_v50 = vld [vmem:[#allocation13 + $0x38] sm:$0xff]  }
 0x3ce   :  { %800 = vmax.xlane.f32.xlu0 %v794_v37  ;;  %v2713_v4 = vpop.f32.mrb[7].mxu1  ;;  %v797_v5 = vadd.f32 %v796_v3, %v758_v59  ;;  %v2421_v59 = vld [vmem:[%s4259_s10] ss:$0 sm:$0xff] }
 0x3d2   :  { %802 = vmax.xlane.f32.xlu0 %v797_v5 }
 0x45b   :  { %v801_v6 = vpop.xlane.xlu0 %800 }
 0x45c   :  { %v804_v7 = vsub.f32 %v794_v37, %v801_v6  ;;  %v2963_v37 = vld [vmem:[#allocation13 + $0x30] sm:$0xff]  }
 0x45e   :  { %v806_v8 = vmul.f32 1.442695, %v804_v7 }
 0x45f   :  { %v803_v9 = vpop.xlane.xlu0 %802 }
 0x460   :  { %v805_v10 = vsub.f32 %v797_v5, %v803_v9  ;;  %3021 = vpow2.f32 %v806_v8 }
 0x462   :  { %v808_v11 = vmul.f32 1.442695, %v805_v10 }
 0x464   :  { %3023 = vpow2.f32 %v808_v11 }
 0x46a   :  { %v3022_v12 = vpop.eup %3021 }
 0x46e   :  { %v3024_v13 = vpop.eup %3023 }
 0x46f   :  { %v810_v15 = vpack.c.bf16 %v3024_v13, %v3022_v12 }
 0x471   :  { %2731 = vmatmul.mubr.bf16.vlgmr.msra.gmra.mrb[36].mxu0 %v810_v15  ;;  %2751 = vmatmul.mubr.bf16.vlgmr.msra.gmra.mrb[8].mxu1 %v810_v15 }
 0x472   :  { %2755 = vmatpush3.bf16.msra.mxu0 %v2923_v14  ;;  %2770 = vmatprep.mubr.msk.bf16.mxu0 %vm3341_vm0, %v4276_v0 }
 0x473   :  { %2756 = vmatprep.subr.bf16.mxu0 %v4276_v0  ;;  %2790 = vmatprep.mubr.msk.bf16.mxu1 %vm3341_vm0, %v4276_v0 }
 0x474   :  { %2775 = vmatpush3.bf16.msra.mxu1 %v2957_v24  ;;  %v2967_v24 = vld [vmem:[%s4255_s6 + $0x10] sm:$0xff]  }
 0x475   :  { %2776 = vmatprep.subr.bf16.mxu1 %v4276_v0 }
 0x476   :  { %2757 = vmatpush3.bf16.msra.mxu0 %v2924_v16 }
 0x477   :  { %2758 = vmatprep.subr.bf16.mxu0 %v4276_v0 }
 0x478   :  { %2777 = vmatpush3.bf16.msra.mxu1 %v2958_v27  ;;  %v2968_v27 = vld [vmem:[%s4255_s6 + $0x18] sm:$0xff]  }
 0x479   :  { %2778 = vmatprep.subr.bf16.mxu1 %v4276_v0 }
 0x47a   :  { %2759 = vmatpush3.bf16.msra.mxu0 %v2925_v17 }
 0x47b   :  { %2760 = vmatprep.subr.bf16.mxu0 %v4276_v0 }
 0x47c   :  { %2779 = vmatpush3.bf16.msra.mxu1 %v2959_v28  ;;  %v2969_v28 = vld [vmem:[%s4255_s6 + $0x20] sm:$0xff]  }
 0x47d   :  { %2780 = vmatprep.subr.bf16.mxu1 %v4276_v0 }
 0x47e   :  { %2761 = vmatpush3.bf16.msra.mxu0 %v2926_v18 }
 0x47f   :  { %2762 = vmatprep.subr.bf16.mxu0 %v4276_v0 }
 0x480   :  { %2781 = vmatpush3.bf16.msra.mxu1 %v2960_v29  ;;  %v2970_v29 = vld [vmem:[%s4255_s6 + $0x28] sm:$0xff]  }
 0x481   :  { %2782 = vmatprep.subr.bf16.mxu1 %v4276_v0 }
 0x482   :  { %2763 = vmatpush3.bf16.msra.mxu0 %v2927_v19 }
 0x483   :  { %2764 = vmatprep.subr.bf16.mxu0 %v4276_v0 }
 0x484   :  { %2783 = vmatpush3.bf16.msra.mxu1 %v2961_v31  ;;  %v2971_v31 = vld [vmem:[%s4255_s6 + $0x30] sm:$0xff]  }
 0x485   :  { %2784 = vmatprep.subr.bf16.mxu1 %v4276_v0 }
 0x486   :  { %2765 = vmatpush3.bf16.msra.mxu0 %v2928_v20 }
 0x487   :  { %2766 = vmatprep.subr.bf16.mxu0 %v4276_v0 }
 0x488   :  { %2785 = vmatpush3.bf16.msra.mxu1 %v2962_v32  ;;  %v2972_v32 = vld [vmem:[%s4255_s6 + $0x38] sm:$0xff]  }
 0x489   :  { %2786 = vmatprep.subr.bf16.mxu1 %v4276_v0 }
 0x48a   :  { %2767 = vmatpush3.bf16.msra.mxu0 %v2929_v21 }
 0x48b   :  { %2768 = vmatprep.subr.bf16.mxu0 %v4276_v0 }
 0x48c   :  { %2787 = vmatpush3.bf16.msra.mxu1 %v2963_v37 }
 0x48d   :  { %2788 = vmatprep.subr.bf16.mxu1 %v4276_v0 }
 0x48e   :  { %2769 = vmatpush3.bf16.msra.mxu0 %v2930_v22  ;;  %v2965_v22 = vld [vmem:[%s4255_s6] sm:$0xff]  }
 0x48f   :  { %1227 = vmatprep.subr.bf16.mxu0 %v2933_v23  ;;  %v2966_v23 = vld [vmem:[%s4255_s6 + $0x8] sm:$0xff]  }
 0x490   :  { %2789 = vmatpush3.bf16.msra.mxu1 %v2964_v50 }
 0x544   :  { %v845_v33 = vpop.f32.mrb[36].mxu0  ;;  %v886_v34 = vpop.f32.mrb[8].mxu1 }
 0x545   :  { %3025 = vrcp.f32 %v886_v34  ;;  %v2732_v36 = vpop.f32.mrb[37].mxu0  ;;  %v2752_v38 = vpop.f32.mrb[9].mxu1  ;;  %v2974_v34 = vld [vmem:[%s4255_s6 + $0x48] sm:$0xff]  }
 0x546   :  { %v848_v39 = vpop.f32.mrb[38].mxu0  ;;  %v889_v40 = vpop.f32.mrb[10].mxu1  ;;  %v2975_v36 = vld [vmem:[%s4255_s6 + $0x50] sm:$0xff]   ;;  %v2976_v38 = vld [vmem:[%s4255_s6 + $0x58] sm:$0xff]  }
 0x547   :  { %3027 = vrcp.f32 %v889_v40  ;;  %v2733_v41 = vpop.f32.mrb[39].mxu0  ;;  %v2753_v42 = vpop.f32.mrb[11].mxu1  ;;  %v2978_v40 = vld [vmem:[%s4255_s6 + $0x68] sm:$0xff]  }
 0x548   :  { %v2979_v41 = vld [vmem:[%s4255_s6 + $0x70] sm:$0xff]   ;;  %v2980_v42 = vld [vmem:[%s4255_s6 + $0x78] sm:$0xff]  }
 0x54f   :  { %v3026_v43 = vpop.eup %3025 }
 0x550   :  { %v895_v44 = vmul.f32 %v3026_v43, %v845_v33  ;;  %v2973_v33 = vld [vmem:[%s4255_s6 + $0x40] sm:$0xff]  }
 0x551   :  { %v3028_v45 = vpop.eup %3027 }
 0x552   :  { %v896_v46 = vmul.f32 %v3028_v45, %v848_v39  ;;  %v2977_v39 = vld [vmem:[%s4255_s6 + $0x60] sm:$0xff]  }
 0x554   :  { %v897_v48 = vpack.c.bf16 %v896_v46, %v895_v44 }
 0x556   :  { %2771 = vmatmul.mubr.bf16.vlgmr.msra.gmra.mrb[40].mxu0 %v897_v48 }
 0x557   :  { %1228 = vmatpush1.bf16.msra.mxu0 %v2931_v47  ;;  %1259 = vmatprep.mubr.bf16.mxu0 %v3342_v1 }
 0x558   :  { %1229 = vmatprep.subr.bf16.mxu0 %v2936_v49 }
 0x55b   :  { %1230 = vmatpush1.bf16.msra.mxu0 %v2934_v51 }
 0x55c   :  { %1231 = vmatprep.subr.bf16.mxu0 %v2939_v52 }
 0x55f   :  { %1232 = vmatpush1.bf16.msra.mxu0 %v2937_v53 }
 0x560   :  { %1233 = vmatprep.subr.bf16.mxu0 %v2942_v54 }
 0x563   :  { %1234 = vmatpush1.bf16.msra.mxu0 %v2940_v55 }
 0x564   :  { %1235 = vmatprep.subr.bf16.mxu0 %v2945_v56 }
 0x567   :  { %1236 = vmatpush1.bf16.msra.mxu0 %v2943_v57 }
 0x568   :  { %1237 = vmatprep.subr.bf16.mxu0 %v2948_v58 }
 0x56b   :  { %1238 = vmatpush1.bf16.msra.mxu0 %v2946_v60 }
 0x56c   :  { %1239 = vmatprep.subr.bf16.mxu0 %v2951_v61 }
 0x56f   :  { %1240 = vmatpush1.bf16.msra.mxu0 %v2949_v62 }
 0x570   :  { %1241 = vmatprep.subr.bf16.mxu0 %v2954_v63 }
 0x573   :  { %1242 = vmatpush1.bf16.msra.mxu0 %v2952_v2 }
 0x576   :  { %1260 = vmatmul.mubr.bf16.vlgmr.msra.gmra.mrb[44].mxu0 %v2955_v30 }
 0x577   :  { %1269 = vmatprep.mubr.bf16.mxu0 %v3342_v1 }
 0x57e   :  { %1270 = vmatmul.mubr.bf16.gmra.mrb[48].mxu0 %v2956_v35 }
 0x629   :  { %v1003_v3 = vpop.f32.mrb[40].mxu0 }
 0x62a   :  { %v1004_v4 = vadd.f32 %v2421_v59, %v1003_v3  ;;  %v2772_v5 = vpop.f32.mrb[41].mxu0 }
 0x62b   :  { %v1006_v6 = vpop.f32.mrb[42].mxu0 }
 0x62c   :  { %v1007_v7 = vadd.f32 %v2421_v59, %v1006_v6  ;;  %v2773_v8 = vpop.f32.mrb[43].mxu0  ;;  %v3844_v9 = vadd.f32 %v1004_v4, %v3685_v25 }
 0x62e   :  { %v3847_v10 = vadd.f32 %v1007_v7, %v3687_v26 }
 0x630   :  { %v1012_v11 = vpack.c.bf16 %v3847_v10, %v3844_v9 }
 0x632   :  { %2791 = vmatmul.mubr.bf16.vlgmr.msra.gmra.mrb[12].mxu1 %v1012_v11 }
 0x633   :  { %1509 = vmatprep.mubr.bf16.mxu1 %v3342_v1 }
 0x649   :  { %v1261_v12 = vpop.f32.mrb[44].mxu0 }
 0x64a   :  { %v1263_v13 = vpop.f32.mrb[45].mxu0 }
 0x64b   :  { %v1265_v14 = vpop.f32.mrb[46].mxu0 }
 0x64c   :  { %v1280_v15 = vpack.c.bf16 %v1265_v14, %v1261_v12  ;;  %v1267_v16 = vpop.f32.mrb[47].mxu0 }
 0x64d   :  { %v1281_v17 = vpack.c.bf16 %v1267_v16, %v1263_v13  ;;  %v4065_v13 = vld [vmem:[#allocation10 + $0x58] sm:$0xff]  }
 0x64f   :  { %1477 = vmatprep.subr.bf16.mxu1 %v1281_v17 }
 0x650   :  { %1478 = vmatpush1.bf16.msra.mxu1 %v1280_v15 }
 0x651   :  { %v1271_v18 = vpop.f32.mrb[48].mxu0 }
 0x652   :  { %v1273_v25 = vpop.f32.mrb[49].mxu0 }
 0x653   :  { %v1275_v19 = vpop.f32.mrb[50].mxu0 }
 0x654   :  { %v1282_v20 = vpack.c.bf16 %v1275_v19, %v1271_v18  ;;  %v1277_v26 = vpop.f32.mrb[51].mxu0 }
 0x655   :  { %v1283_v21 = vpack.c.bf16 %v1277_v26, %v1273_v25 }
 0x657   :  { %1479 = vmatprep.subr.bf16.mxu1 %v1283_v21 }
 0x658   :  { %1480 = vmatpush1.bf16.msra.mxu1 %v1282_v20 }
 0x659   :  { %2794 = vmatprep.subr.bf16.mxu1 %v4276_v0 }
 0x65b   :  { %2472 = vmatmul.mubr.msk.bf16.vlgmr.msra.gmra.mrb[16].mxu1 %vm1428_vm2, %v2965_v22 }
 0x65c   :  { %1519 = vmatprep.mubr.bf16.mxu1 %v3342_v1 }
 0x663   :  { %2473 = vmatmul.mubr.msk.bf16.gmra.mrb[20].mxu1 %vm1428_vm2, %v2966_v23 }
 0x664   :  { %1529 = vmatprep.mubr.bf16.mxu1 %v3342_v1 }
 0x66b   :  { %2474 = vmatmul.mubr.msk.bf16.gmra.mrb[24].mxu1 %vm1428_vm2, %v2967_v24 }
 0x66c   :  { %1539 = vmatprep.mubr.bf16.mxu1 %v3342_v1 }
 0x673   :  { %2475 = vmatmul.mubr.msk.bf16.gmra.mrb[28].mxu1 %vm1428_vm2, %v2968_v27 }
 0x674   :  { %1549 = vmatprep.mubr.bf16.mxu1 %v3342_v1 }
 0x67b   :  { %2476 = vmatmul.mubr.msk.bf16.gmra.mrb[32].mxu1 %vm1428_vm2, %v2969_v28 }
 0x67c   :  { %1559 = vmatprep.mubr.bf16.mxu1 %v3342_v1 }
 0x683   :  { %2477 = vmatmul.mubr.msk.bf16.gmra.mrb[36].mxu1 %vm1428_vm2, %v2970_v29 }
 0x684   :  { %1569 = vmatprep.mubr.bf16.mxu1 %v3342_v1 }
 0x68b   :  { %2478 = vmatmul.mubr.msk.bf16.gmra.mrb[40].mxu1 %vm1428_vm2, %v2971_v31 }
 0x68c   :  { %1579 = vmatprep.mubr.bf16.mxu1 %v3342_v1 }
 0x693   :  { %2479 = vmatmul.mubr.msk.bf16.gmra.mrb[44].mxu1 %vm1428_vm2, %v2972_v32  ;;  %v4052_v32 = vld [vmem:[#allocation10 + $0x10] sm:$0xff]  }
 0x694   :  { %1589 = vmatprep.mubr.bf16.mxu1 %v3342_v1 }
 0x69b   :  { %2480 = vmatmul.mubr.msk.bf16.gmra.mrb[48].mxu1 %vm1428_vm2, %v2973_v33 }
 0x69c   :  { %1599 = vmatprep.mubr.bf16.mxu1 %v3342_v1 }
 0x6a3   :  { %2481 = vmatmul.mubr.msk.bf16.gmra.mrb[52].mxu1 %vm1428_vm2, %v2974_v34 }
 0x6a4   :  { %1609 = vmatprep.mubr.bf16.mxu1 %v3342_v1 }
 0x6ab   :  { %2482 = vmatmul.mubr.msk.bf16.gmra.mrb[56].mxu1 %vm1428_vm2, %v2975_v36  ;;  %v4026_v36 = vld [vmem:[#allocation10 + $0x40] sm:$0xff]  }
 0x6ac   :  { %1619 = vmatprep.mubr.bf16.mxu1 %v3342_v1 }
 0x6b3   :  { %2483 = vmatmul.mubr.msk.bf16.gmra.mrb[60].mxu1 %vm1428_vm2, %v2976_v38  ;;  %v4028_v38 = vld [vmem:[#allocation10] sm:$0xff]  }
 0x6b4   :  { %1629 = vmatprep.mubr.bf16.mxu1 %v3342_v1 }
 0x6bb   :  { %2484 = vmatmul.mubr.msk.bf16.gmra.mrb[64].mxu1 %vm1428_vm2, %v2977_v39 }
 0x6bc   :  { %1639 = vmatprep.mubr.bf16.mxu1 %v3342_v1 }
 0x6c3   :  { %2485 = vmatmul.mubr.msk.bf16.gmra.mrb[68].mxu1 %vm1428_vm2, %v2978_v40 }
 0x6c4   :  { %1649 = vmatprep.mubr.bf16.mxu1 %v3342_v1 }
 0x6cb   :  { %2486 = vmatmul.mubr.msk.bf16.gmra.mrb[72].mxu1 %vm1428_vm2, %v2979_v41 }
 0x6cc   :  { %1659 = vmatprep.mubr.bf16.mxu1 %v3342_v1 }
 0x6d3   :  { %2487 = vmatmul.mubr.msk.bf16.gmra.mrb[76].mxu1 %vm1428_vm2, %v2980_v42 }
 0x6d4   :  { %2810 = vmatprep.mubr.msk.bf16.mxu1 %vm3341_vm0, %v4276_v0  ;;  %v4050_v0 = vld [vmem:[#allocation10 + $0x50] sm:$0xff]  }
 0x705   :  { %v1111_v43 = vpop.f32.mrb[12].mxu1 }
 0x706   :  { %v2792_v44 = vpop.f32.mrb[13].mxu1 }
 0x707   :  { %v1114_v45 = vpop.f32.mrb[14].mxu1 }
 0x708   :  { %v3934_v46 = vpack.c.bf16 %v1114_v45, %v1111_v43  ;;  %v2793_v47 = vpop.f32.mrb[15].mxu1 }
 0x70a   :  { %2601 = vmatprep.mubr.bf16.mxu0 %v3934_v46 }
 0x72e   :  { %v1511_v48 = vpop.f32.mrb[16].mxu1 }
 0x72f   :  { %v3937_v49 = vpop.f32.mrb[17].mxu1 }
 0x730   :  { %v1515_v1 = vpop.f32.mrb[18].mxu1 }
 0x731   :  { %v1670_v51 = vpack.c.bf16 %v1515_v1, %v1511_v48  ;;  %v3939_v52 = vpop.f32.mrb[19].mxu1  ;;  %v4038_v48 = vld [vmem:[#allocation10 + $0x48] sm:$0xff]  }
 0x732   :  { %v4040_v1 = vld [vmem:[#allocation10 + $0x8] sm:$0xff]  }
 0x733   :  { %v1798_v44 = vmul.bf16 %v4028_v38, %v1670_v51 }
 0x736   :  { %v3943_v54 = vpop.f32.mrb[20].mxu1 }
 0x737   :  { %v3945_v55 = vpop.f32.mrb[21].mxu1 }
 0x738   :  { %v1525_v56 = vpop.f32.mrb[22].mxu1 }
 0x739   :  { %v1672_v57 = vpack.c.bf16 %v1525_v56, %v3943_v54  ;;  %v3948_v58 = vpop.f32.mrb[23].mxu1 }
 0x73b   :  { %v1799_v51 = vmul.bf16 %v4040_v1, %v1672_v57 }
 0x73e   :  { %v3952_v61 = vpop.f32.mrb[24].mxu1 }
 0x73f   :  { %v3954_v62 = vpop.f32.mrb[25].mxu1 }
 0x740   :  { %v3956_v63 = vpop.f32.mrb[26].mxu1 }
 0x741   :  { %v1674_v2 = vpack.c.bf16 %v3956_v63, %v3952_v61  ;;  %v3960_v30 = vpop.f32.mrb[27].mxu1 }
 0x743   :  { %v1800_v57 = vmul.bf16 %v4052_v32, %v1674_v2 }
 0x746   :  { %v3964_v37 = vpop.f32.mrb[28].mxu1 }
 0x747   :  { %v3966_v50 = vpop.f32.mrb[29].mxu1 }
 0x748   :  { %v3968_v59 = vpop.f32.mrb[30].mxu1 }
 0x749   :  { %v1676_v3 = vpack.c.bf16 %v3968_v59, %v3964_v37  ;;  %v3972_v4 = vpop.f32.mrb[31].mxu1 }
 0x74e   :  { %v3976_v6 = vpop.f32.mrb[32].mxu1 }
 0x74f   :  { %v3978_v7 = vpop.f32.mrb[33].mxu1 }
 0x750   :  { %v3980_v8 = vpop.f32.mrb[34].mxu1 }
 0x751   :  { %v1678_v11 = vpack.c.bf16 %v3980_v8, %v3976_v6  ;;  %v3984_v12 = vpop.f32.mrb[35].mxu1 }
 0x756   :  { %v3988_v14 = vpop.f32.mrb[36].mxu1 }
 0x757   :  { %v3990_v15 = vpop.f32.mrb[37].mxu1 }
 0x758   :  { %v3992_v16 = vpop.f32.mrb[38].mxu1 }
 0x759   :  { %v1680_v17 = vpack.c.bf16 %v3992_v16, %v3988_v14  ;;  %v3996_v18 = vpop.f32.mrb[39].mxu1 }
 0x75e   :  { %v4000_v19 = vpop.f32.mrb[40].mxu1 }
 0x75f   :  { %v4002_v20 = vpop.f32.mrb[41].mxu1 }
 0x760   :  { %v4004_v26 = vpop.f32.mrb[42].mxu1 }
 0x761   :  { %v1682_v21 = vpack.c.bf16 %v4004_v26, %v4000_v19  ;;  %v4008_v22 = vpop.f32.mrb[43].mxu1 }
 0x766   :  { %v4012_v24 = vpop.f32.mrb[44].mxu1 }
 0x767   :  { %v4014_v27 = vpop.f32.mrb[45].mxu1 }
 0x768   :  { %v4016_v28 = vpop.f32.mrb[46].mxu1 }
 0x769   :  { %v1684_v29 = vpack.c.bf16 %v4016_v28, %v4012_v24  ;;  %v4020_v31 = vpop.f32.mrb[47].mxu1  ;;  %v4291_v28 = vpack.c.bf16 %v3948_v58, %v3945_v55  ;;  %v4295_v55 = vpack.c.bf16 %v3972_v4, %v3966_v50 }
 0x76e   :  { %v1591_v33 = vpop.f32.mrb[48].mxu1 }
 0x76f   :  { %v4024_v34 = vpop.f32.mrb[49].mxu1 }
 0x770   :  { %v1595_v39 = vpop.f32.mrb[50].mxu1 }
 0x771   :  { %v1686_v40 = vpack.c.bf16 %v1595_v39, %v1591_v33  ;;  %v4030_v41 = vpop.f32.mrb[51].mxu1 }
 0x772   :  { %v1687_v42 = vpack.c.bf16 %v4030_v41, %v4024_v34 }
 0x773   :  { %v1806_v43 = vmul.bf16 %v4026_v36, %v1686_v40 }
 0x774   :  { %v1822_v26 = vmul.bf16 %v4026_v36, %v1687_v42 }
 0x775   :  { %2585 = vmatprep.subr.bf16.mxu0 %v1806_v43 }
 0x776   :  { %v1601_v45 = vpop.f32.mrb[52].mxu1  ;;  %2586 = vmatpush3.bf16.xpose.msra.mxu0 %v1798_v44 }
 0x777   :  { %v4036_v47 = vpop.f32.mrb[53].mxu1 }
 0x778   :  { %v1605_v54 = vpop.f32.mrb[54].mxu1 }
 0x779   :  { %v1688_v56 = vpack.c.bf16 %v1605_v54, %v1601_v45  ;;  %v4042_v33 = vpop.f32.mrb[55].mxu1 }
 0x77b   :  { %v1807_v40 = vmul.bf16 %v4038_v48, %v1688_v56 }
 0x77d   :  { %2587 = vmatprep.subr.bf16.mxu0 %v1807_v40 }
 0x77e   :  { %v1611_v43 = vpop.f32.mrb[56].mxu1  ;;  %2588 = vmatpush3.bf16.xpose.msra.mxu0 %v1799_v51 }
 0x77f   :  { %v4048_v44 = vpop.f32.mrb[57].mxu1 }
 0x780   :  { %v1615_v23 = vpop.f32.mrb[58].mxu1 }
 0x781   :  { %v1690_v45 = vpack.c.bf16 %v1615_v23, %v1611_v43  ;;  %v4054_v54 = vpop.f32.mrb[59].mxu1  ;;  %v4067_v23 = vld [vmem:[#allocation10 + $0x18] sm:$0xff]  }
 0x782   :  { %v1801_v63 = vmul.bf16 %v4067_v23, %v1676_v3  ;;  %v4292_v34 = vpack.c.bf16 %v4054_v54, %v4048_v44  ;;  %v1817_v58 = vmul.bf16 %v4067_v23, %v4295_v55  ;;  %v4298_v44 = vpack.c.bf16 %v4008_v22, %v4002_v20  ;;  %v1831_v54 = vld [vmem:[#allocation8 + $0x8] sm:$0xff]  ;;  %v1832_v20 = vld [vmem:[#allocation8 + $0x10] sm:$0xff]  ;;  %v1833_v22 = vld [vmem:[#allocation8 + $0x18] sm:$0xff] }
 0x783   :  { %v1808_v56 = vmul.bf16 %v4050_v0, %v1690_v45 }
 0x785   :  { %2589 = vmatprep.subr.bf16.mxu0 %v1808_v56 }
 0x786   :  { %v1621_v40 = vpop.f32.mrb[60].mxu1  ;;  %2590 = vmatpush3.bf16.xpose.msra.mxu0 %v1800_v57  ;;  %v4080_v57 = vld [vmem:[#allocation10 + $0x60] sm:$0xff]  }
 0x787   :  { %v4063_v51 = vpop.f32.mrb[61].mxu1 }
 0x788   :  { %v1625_v43 = vpop.f32.mrb[62].mxu1 }
 0x789   :  { %v1692_v5 = vpack.c.bf16 %v1625_v43, %v1621_v40  ;;  %v4069_v35 = vpop.f32.mrb[63].mxu1  ;;  %v4082_v40 = vld [vmem:[#allocation10 + $0x20] sm:$0xff]  }
 0x78a   :  { %v1802_v37 = vmul.bf16 %v4082_v40, %v1678_v11 }
 0x78b   :  { %v1809_v61 = vmul.bf16 %v4065_v13, %v1692_v5 }
 0x78d   :  { %2591 = vmatprep.subr.bf16.mxu0 %v1809_v61  ;;  %v4090_v61 = vld [vmem:[#allocation10 + $0x68] sm:$0xff]  }
 0x78e   :  { %v1631_v2 = vpop.f32.mrb[64].mxu1  ;;  %2592 = vmatpush3.bf16.xpose.msra.mxu0 %v1801_v63  ;;  %v4092_v63 = vld [vmem:[#allocation10 + $0x28] sm:$0xff]  }
 0x78f   :  { %v4078_v56 = vpop.f32.mrb[65].mxu1  ;;  %v1803_v6 = vmul.bf16 %v4092_v63, %v1680_v17 }
 0x790   :  { %v1635_v43 = vpop.f32.mrb[66].mxu1 }
 0x791   :  { %v1694_v25 = vpack.c.bf16 %v1635_v43, %v1631_v2  ;;  %v1637_v60 = vpop.f32.mrb[67].mxu1 }
 0x792   :  { %v1695_v45 = vpack.c.bf16 %v1637_v60, %v4078_v56  ;;  %v4101_v56 = vld [vmem:[#allocation10 + $0x30] sm:$0xff]  }
 0x793   :  { %v1810_v5 = vmul.bf16 %v4080_v57, %v1694_v25  ;;  %v4099_v25 = vld [vmem:[#allocation10 + $0x70] sm:$0xff]   ;;  %v1804_v14 = vmul.bf16 %v4101_v56, %v1682_v21  ;;  %v4289_v21 = vpack.c.bf16 %v3939_v52, %v3937_v49  ;;  %v1824_v49 = vmul.bf16 %v4050_v0, %v4292_v34 }
 0x794   :  { %v4293_v52 = vpack.c.bf16 %v3960_v30, %v3954_v62  ;;  %v4296_v62 = vpack.c.bf16 %v3984_v12, %v3978_v7  ;;  %v1820_v7 = vmul.bf16 %v4101_v56, %v4298_v44 }
 0x795   :  { %2593 = vmatprep.subr.bf16.mxu0 %v1810_v5 }
 0x796   :  { %v1641_v59 = vpop.f32.mrb[68].mxu1  ;;  %2594 = vmatpush3.bf16.xpose.msra.mxu0 %v1802_v37  ;;  %v1816_v41 = vmul.bf16 %v4052_v32, %v4293_v52  ;;  %v1818_v30 = vmul.bf16 %v4082_v40, %v4296_v62 }
 0x797   :  { %v1643_v3 = vpop.f32.mrb[69].mxu1 }
 0x798   :  { %v1645_v39 = vpop.f32.mrb[70].mxu1 }
 0x799   :  { %v1696_v2 = vpack.c.bf16 %v1645_v39, %v1641_v59  ;;  %v1647_v43 = vpop.f32.mrb[71].mxu1 }
 0x79a   :  { %v1697_v53 = vpack.c.bf16 %v1647_v43, %v1643_v3  ;;  %v4110_v43 = vld [vmem:[#allocation10 + $0x38] sm:$0xff]  }
 0x79b   :  { %v1811_v60 = vmul.bf16 %v4090_v61, %v1696_v2  ;;  %v4108_v2 = vld [vmem:[#allocation10 + $0x78] sm:$0xff]   ;;  %v1805_v19 = vmul.bf16 %v4110_v43, %v1684_v29  ;;  %v1815_v29 = vmul.bf16 %v4040_v1, %v4291_v28 }
 0x79d   :  { %2595 = vmatprep.subr.bf16.mxu0 %v1811_v60 }
 0x79e   :  { %v1651_v8 = vpop.f32.mrb[72].mxu1  ;;  %2596 = vmatpush3.bf16.xpose.msra.mxu0 %v1803_v6 }
 0x79f   :  { %v1653_v11 = vpop.f32.mrb[73].mxu1 }
 0x7a0   :  { %v1655_v5 = vpop.f32.mrb[74].mxu1 }
 0x7a1   :  { %v1698_v37 = vpack.c.bf16 %v1655_v5, %v1651_v8  ;;  %v1657_v39 = vpop.f32.mrb[75].mxu1 }
 0x7a2   :  { %v1699_v59 = vpack.c.bf16 %v1657_v39, %v1653_v11  ;;  %v4290_v39 = vpack.c.bf16 %v4042_v33, %v4036_v47  ;;  %v1826_v47 = vmul.bf16 %v4080_v57, %v1695_v45  ;;  %v4297_v33 = vpack.c.bf16 %v3996_v18, %v3990_v15  ;;  %v1830_v18 = vld [vmem:[#allocation8] sm:$0xff] }
 0x7a3   :  { %v1812_v3 = vmul.bf16 %v4099_v25, %v1698_v37  ;;  %v1814_v37 = vmul.bf16 %v4028_v38, %v4289_v21 }
 0x7a4   :  { %v1823_v24 = vmul.bf16 %v4038_v48, %v4290_v39  ;;  %v1819_v50 = vmul.bf16 %v4092_v63, %v4297_v33  ;;  %v1828_v4 = vmul.bf16 %v4099_v25, %v1699_v59 }
 0x7a5   :  { %2597 = vmatprep.subr.bf16.mxu0 %v1812_v3 }
 0x7a6   :  { %v1661_v16 = vpop.f32.mrb[76].mxu1  ;;  %2598 = vmatpush3.bf16.xpose.msra.mxu0 %v1804_v14 }
 0x7a7   :  { %v1663_v17 = vpop.f32.mrb[77].mxu1 }
 0x7a8   :  { %v1665_v60 = vpop.f32.mrb[78].mxu1 }
 0x7a9   :  { %v1700_v6 = vpack.c.bf16 %v1665_v60, %v1661_v16  ;;  %v1667_v8 = vpop.f32.mrb[79].mxu1 }
 0x7aa   :  { %v1701_v5 = vpack.c.bf16 %v1667_v8, %v1663_v17  ;;  %v2998_v8 = vld [vmem:[#allocation16 + $0x8] sm:$0xff]  }
 0x7ab   :  { %v1813_v11 = vmul.bf16 %v4108_v2, %v1700_v6 }
 0x7ac   :  { %v1829_v12 = vmul.bf16 %v4108_v2, %v1701_v5  ;;  %v2999_v5 = vld [vmem:[#allocation16 + $0x10] sm:$0xff]  }
 0x7ad   :  { %2599 = vmatprep.subr.bf16.mxu0 %v1813_v11  ;;  %v3000_v11 = vld [vmem:[#allocation16 + $0x18] sm:$0xff]  }
 0x7ae   :  { %2600 = vmatpush3.bf16.xpose.msra.mxu0 %v1805_v19  ;;  %v3001_v19 = vld [vmem:[#allocation16 + $0x20] sm:$0xff]  }
 0x7af   :  { %2603 = vmatprep.subr.bf16.mxu0 %v1822_v26 }
 0x7b5   :  { %2602 = vmatmul.mubr.bf16.vlgmr.msra.gmra.mrb[52].mxu0 %v3934_v46  ;;  %v4294_v46 = vpack.c.bf16 %v4069_v35, %v4063_v51  ;;  %v1827_v35 = vmul.bf16 %v4090_v61, %v1697_v53  ;;  %v4299_v53 = vpack.c.bf16 %v4020_v31, %v4014_v27  ;;  %v2997_v31 = vld [vmem:[#allocation16] sm:$0xff]  }
 0x7b6   :  { %2604 = vmatpush3.bf16.msra.mxu0 %v1814_v37  ;;  %2795 = vmatpush3.bf16.msra.mxu1 %v2997_v31  ;;  %v3010_v31 = vld [vmem:[#allocation17 + $0x28] sm:$0xff]  }
 0x7b7   :  { %2605 = vmatprep.subr.bf16.mxu0 %v1823_v24  ;;  %v1825_v42 = vmul.bf16 %v4065_v13, %v4294_v46  ;;  %v1821_v15 = vmul.bf16 %v4110_v43, %v4299_v53 }
 0x7ba   :  { %2606 = vmatpush3.bf16.msra.mxu0 %v1815_v29 }
 0x7bb   :  { %2607 = vmatprep.subr.bf16.mxu0 %v1824_v49 }
 0x7be   :  { %2608 = vmatpush3.bf16.msra.mxu0 %v1816_v41 }
 0x7bf   :  { %2609 = vmatprep.subr.bf16.mxu0 %v1825_v42 }
 0x7c2   :  { %2610 = vmatpush3.bf16.msra.mxu0 %v1817_v58 }
 0x7c3   :  { %2611 = vmatprep.subr.bf16.mxu0 %v1826_v47 }
 0x7c6   :  { %2612 = vmatpush3.bf16.msra.mxu0 %v1818_v30 }
 0x7c7   :  { %2613 = vmatprep.subr.bf16.mxu0 %v1827_v35 }
 0x7ca   :  { %2614 = vmatpush3.bf16.msra.mxu0 %v1819_v50 }
 0x7cb   :  { %2615 = vmatprep.subr.bf16.mxu0 %v1828_v4  ;;  %v2504_v4 = vld [vmem:[%s4263_s14] ss:$0 sm:$0xff] }
 0x7ce   :  { %2616 = vmatpush3.bf16.msra.mxu0 %v1820_v7 }
 0x7cf   :  { %2617 = vmatprep.subr.bf16.mxu0 %v1829_v12 }
 0x7d2   :  { %2618 = vmatpush3.bf16.msra.mxu0 %v1821_v15 }
 0x7d3   :  { %2625 = vmatprep.subr.bf16.mxu0 %v4026_v36  ;;  %v4300_v36 = vmov 0.0  }
 0x7d4   :  { %2796 = vmatprep.subr.bf16.mxu1 %v4300_v36 }
 0x7d5   :  { %2797 = vmatpush3.bf16.msra.mxu1 %v2998_v8  ;;  %v3011_v8 = vld [vmem:[#allocation17 + $0x30] sm:$0xff]  }
 0x7d6   :  { %2798 = vmatprep.subr.bf16.mxu1 %v4300_v36 }
 0x7d9   :  { %2799 = vmatpush3.bf16.msra.mxu1 %v2999_v5  ;;  %v3012_v5 = vld [vmem:[#allocation17 + $0x38] sm:$0xff]  }
 0x7da   :  { %2800 = vmatprep.subr.bf16.mxu1 %v4300_v36 }
 0x7dd   :  { %2801 = vmatpush3.bf16.msra.mxu1 %v3000_v11  ;;  %v3013_v11 = vld [vmem:[#allocation19] sm:$0xff]  }
 0x7de   :  { %2802 = vmatprep.subr.bf16.mxu1 %v4300_v36 }
 0x7e1   :  { %2803 = vmatpush3.bf16.msra.mxu1 %v3001_v19  ;;  %v3014_v19 = vld [vmem:[#allocation19 + $0x8] sm:$0xff]  }
 0x7e2   :  { %2804 = vmatprep.subr.bf16.mxu1 %v4300_v36 }
 0x888   :  { %v1868_v51 = vpop.f32.mrb[52].mxu0 }
 0x889   :  { %v1869_v45 = vadd.f32 %v1868_v51, %v1830_v18  ;;  %v1870_v59 = vpop.f32.mrb[53].mxu0 }
 0x88a   :  { %v1871_v3 = vadd.f32 %v1870_v59, %v1831_v54  ;;  %v1872_v14 = vpop.f32.mrb[54].mxu0  ;;  %v3006_v59 = vld [vmem:[#allocation17 + $0x8] sm:$0xff]  }
 0x88b   :  { %v1874_v16 = vpop.f32.mrb[55].mxu0  ;;  %v1873_v17 = vadd.f32 %v1872_v14, %v1832_v20  ;;  %v3007_v20 = vld [vmem:[#allocation17 + $0x10] sm:$0xff]  }
 0x88c   :  { %v1875_v60 = vadd.f32 %v1874_v16, %v1833_v22  ;;  %v1877_v6 = vmax.f32 %v1869_v45, %v1871_v3 }
 0x88e   :  { %1878 = vmax.xlane.f32.xlu1 %v1877_v6  ;;  %v1880_v27 = vmax.f32 %v1873_v17, %v1875_v60  ;;  %v3008_v6 = vld [vmem:[#allocation17 + $0x18] sm:$0xff]  }
 0x892   :  { %1881 = vmax.xlane.f32.xlu1 %v1880_v27  ;;  %v3009_v27 = vld [vmem:[#allocation17 + $0x20] sm:$0xff]  }
 0x91b   :  { %v1879_v26 = vpop.xlane.xlu1 %1878 }
 0x91c   :  { %v1883_v21 = vsub.f32 %v1869_v45, %v1879_v26  ;;  %v1884_v37 = vsub.f32 %v1871_v3, %v1879_v26  ;;  %v3005_v45 = vld [vmem:[#allocation17] sm:$0xff]   ;;  %v3015_v26 = vld [vmem:[#allocation19 + $0x10] sm:$0xff]  }
 0x91e   :  { %v1887_v39 = vmul.f32 1.442695, %v1883_v21  ;;  %v1889_v24 = vmul.f32 1.442695, %v1884_v37  ;;  %v3016_v21 = vld [vmem:[#allocation19 + $0x18] sm:$0xff]   ;;  %v3017_v37 = vld [vmem:[#allocation19 + $0x20] sm:$0xff]  }
 0x91f   :  { %v1882_v28 = vpop.xlane.xlu1 %1881 }
 0x920   :  { %v1885_v29 = vsub.f32 %v1873_v17, %v1882_v28  ;;  %v1886_v34 = vsub.f32 %v1875_v60, %v1882_v28  ;;  %3029 = vpow2.f32 %v1887_v39  ;;  %v3018_v39 = vld [vmem:[#allocation19 + $0x28] sm:$0xff]  }
 0x921   :  { %3031 = vpow2.f32 %v1889_v24 }
 0x922   :  { %v1891_v49 = vmul.f32 1.442695, %v1885_v29  ;;  %v1893_v52 = vmul.f32 1.442695, %v1886_v34 }
 0x924   :  { %3033 = vpow2.f32 %v1891_v49 }
 0x925   :  { %3035 = vpow2.f32 %v1893_v52 }
 0x92a   :  { %v3030_v41 = vpop.eup %3029 }
 0x92b   :  { %v3032_v46 = vpop.eup %3031 }
 0x92e   :  { %v3034_v42 = vpop.eup %3033 }
 0x92f   :  { %v3036_v55 = vpop.eup %3035  ;;  %v1895_v58 = vpack.c.bf16 %v3034_v42, %v3030_v41 }
 0x930   :  { %v1896_v47 = vpack.c.bf16 %v3036_v55, %v3032_v46  ;;  %v3019_v55 = vld [vmem:[#allocation19 + $0x30] sm:$0xff]  }
 0x932   :  { %1929 = vmatprep.mubr.bf16.mxu0 %v1896_v47 }
 0x933   :  { %1930 = vmatmul.mubr.bf16.vlgmr.msra.gmra.mrb[56].mxu0 %v1895_v58 }
 0x934   :  { %2626 = vmatpush3.bf16.msra.mxu0 %v4028_v38  ;;  %1970 = vmatprep.mubr.bf16.mxu0 %v1896_v47  ;;  %v2513_v47 = vld [vmem:[%s4265_s16] ss:$0 sm:$0xff]  ;;  %s2356_s16 = sshll.u32 %s3343_s23, 4  ;;  %s2357_s16 = int_to_ptr.vmem [resolvable:$true] %s2356_s16 }
 0x935   :  { %2627 = vmatprep.subr.bf16.mxu0 %v4038_v48  ;;  %s3287_s17 = scalar_lea.vmem %s2357_s16, 256  ;;  %p3292_p5 = scmp.lt.s32.totalorder %s2357_s16, %s2357_s16 }
 0x936   :  { %p3288_p4 = scmp.ne.s32.totalorder %s2357_s16, %s3287_s17  ;;  %p3293_p6 = scmp.lt.s32.totalorder %s3287_s17, %s3287_s17 }
 0x938   :  { %2628 = vmatpush3.bf16.msra.mxu0 %v4040_v1  ;;  %p3294_p7 = por %p3293_p6, %p3292_p5 }
 0x939   :  { %2629 = vmatprep.subr.bf16.mxu0 %v4050_v0  ;;  %v3002_v0 = vld [vmem:[#allocation16 + $0x28] sm:$0xff]  }
 0x93a   :  { %2805 = vmatpush3.bf16.msra.mxu1 %v3002_v0  ;;  %p3295_p8 = pnand %p3294_p7, %p3288_p4 }
 0x93b   :  { %2806 = vmatprep.subr.bf16.mxu1 %v4300_v36 }
 0x93c   :  { %2630 = vmatpush3.bf16.msra.mxu0 %v4052_v32  ;;  %v3004_v32 = vld [vmem:[#allocation16 + $0x38] sm:$0xff]  }
 0x93d   :  { %2631 = vmatprep.subr.bf16.mxu0 %v4065_v13  ;;  %v3003_v13 = vld [vmem:[#allocation16 + $0x30] sm:$0xff]  }
 0x93e   :  { %2807 = vmatpush3.bf16.msra.mxu1 %v3003_v13 }
 0x93f   :  { %2808 = vmatprep.subr.bf16.mxu1 %v4300_v36 }
 0x940   :  { %2632 = vmatpush3.bf16.msra.mxu0 %v4067_v23 }
 0x941   :  { %2633 = vmatprep.subr.bf16.mxu0 %v4080_v57 }
 0x942   :  { %2809 = vmatpush3.bf16.msra.mxu1 %v3004_v32 }
 0x943   :  { %2834 = vmatprep.subr.bf16.mxu1 %v4300_v36 }
 0x944   :  { %2634 = vmatpush3.bf16.msra.mxu0 %v4082_v40 }
 0x945   :  { %2635 = vmatprep.subr.bf16.mxu0 %v4090_v61 }
 0x948   :  { %2636 = vmatpush3.bf16.msra.mxu0 %v4092_v63 }
 0x949   :  { %2637 = vmatprep.subr.bf16.mxu0 %v4099_v25 }
 0x94c   :  { %2638 = vmatpush3.bf16.msra.mxu0 %v4101_v56 }
 0x94d   :  { %2639 = vmatprep.subr.bf16.mxu0 %v4108_v2 }
 0x950   :  { %2640 = vmatpush3.bf16.msra.mxu0 %v4110_v43 }
 0x951   :  { %2814 = vmatprep.subr.bf16.mxu0 %v4300_v36 }
 0x953   :  { %1971 = vmatmul.mubr.bf16.vlgmr.msra.gmra.mrb[60].mxu0 %v1895_v58  ;;  %v3020_v58 = vld [vmem:[#allocation19 + $0x38] sm:$0xff]  }
 0x954   :  { %2830 = vmatprep.mubr.msk.bf16.mxu0 %vm3341_vm0, %v4300_v36  ;;  %2815 = vmatpush3.bf16.msra.mxu0 %v3005_v45 }
 0x955   :  { %2816 = vmatprep.subr.bf16.mxu0 %v4300_v36 }
 0x958   :  { %2817 = vmatpush3.bf16.msra.mxu0 %v3006_v59 }
 0x959   :  { %2818 = vmatprep.subr.bf16.mxu0 %v4300_v36 }
 0x95c   :  { %2819 = vmatpush3.bf16.msra.mxu0 %v3007_v20 }
 0x95d   :  { %2820 = vmatprep.subr.bf16.mxu0 %v4300_v36 }
 0x960   :  { %2821 = vmatpush3.bf16.msra.mxu0 %v3008_v6 }
 0x961   :  { %2822 = vmatprep.subr.bf16.mxu0 %v4300_v36 }
 0x964   :  { %2823 = vmatpush3.bf16.msra.mxu0 %v3009_v27 }
 0x965   :  { %2824 = vmatprep.subr.bf16.mxu0 %v4300_v36 }
 0x968   :  { %2825 = vmatpush3.bf16.msra.mxu0 %v3010_v31 }
 0x969   :  { %2826 = vmatprep.subr.bf16.mxu0 %v4300_v36 }
 0x96c   :  { %2827 = vmatpush3.bf16.msra.mxu0 %v3011_v8 }
 0x96d   :  { %2828 = vmatprep.subr.bf16.mxu0 %v4300_v36 }
 0x970   :  { %2829 = vmatpush3.bf16.msra.mxu0 %v3012_v5 }
 0xa06   :  { %v2619_v38 = vpop.f32.mrb[56].mxu0 }
 0xa07   :  { %v2620_v48 = vpop.f32.mrb[57].mxu0 }
 0xa08   :  { %v2621_v1 = vadd.f32 %v2620_v48, %v2619_v38  ;;  %v2622_v23 = vpop.f32.mrb[58].mxu0 }
 0xa09   :  { %v2623_v57 = vpop.f32.mrb[59].mxu0 }
 0xa0a   :  { %v2624_v40 = vadd.f32 %v2623_v57, %v2622_v23 }
 0xa26   :  { %v2641_v61 = vpop.f32.mrb[60].mxu0 }
 0xa27   :  { %v2642_v63 = vpop.f32.mrb[61].mxu0 }
 0xa28   :  { %v2643_v25 = vadd.f32 %v2642_v63, %v2641_v61  ;;  %v2644_v56 = vpop.f32.mrb[62].mxu0 }
 0xa29   :  { %v2645_v2 = vpop.f32.mrb[63].mxu0 }
 0xa2a   :  { %3037 = vrcp.f32 %v2643_v25  ;;  %v2646_v43 = vadd.f32 %v2645_v2, %v2644_v56 }
 0xa2c   :  { %3039 = vrcp.f32 %v2646_v43 }
 0xa34   :  { %v3038_v62 = vpop.eup %3037 }
 0xa35   :  { %v1981_v30 = vmul.f32 %v3038_v62, %v2621_v1 }
 0xa36   :  { %v3040_v35 = vpop.eup %3039 }
 0xa37   :  { %v1982_v33 = vmul.f32 %v3040_v35, %v2624_v40 }
 0xa39   :  { %v1983_v50 = vpack.c.bf16 %v1982_v33, %v1981_v30 }
 0xa3b   :  { %2811 = vmatmul.mubr.bf16.vlgmr.msra.gmra.mrb[80].mxu1 %v1983_v50 }
 0xa3c   :  { %2850 = vmatprep.mubr.msk.bf16.mxu1 %vm3341_vm0, %v4300_v36  ;;  %2835 = vmatpush3.bf16.msra.mxu1 %v3013_v11 }
 0xa3d   :  { %2836 = vmatprep.subr.bf16.mxu1 %v4300_v36 }
 0xa40   :  { %2837 = vmatpush3.bf16.msra.mxu1 %v3014_v19 }
 0xa41   :  { %2838 = vmatprep.subr.bf16.mxu1 %v4300_v36 }
 0xa44   :  { %2839 = vmatpush3.bf16.msra.mxu1 %v3015_v26 }
 0xa45   :  { %2840 = vmatprep.subr.bf16.mxu1 %v4300_v36 }
 0xa48   :  { %2841 = vmatpush3.bf16.msra.mxu1 %v3016_v21 }
 0xa49   :  { %2842 = vmatprep.subr.bf16.mxu1 %v4300_v36 }
 0xa4c   :  { %2843 = vmatpush3.bf16.msra.mxu1 %v3017_v37 }
 0xa4d   :  { %2844 = vmatprep.subr.bf16.mxu1 %v4300_v36 }
 0xa50   :  { %2845 = vmatpush3.bf16.msra.mxu1 %v3018_v39 }
 0xa51   :  { %2846 = vmatprep.subr.bf16.mxu1 %v4300_v36 }
 0xa54   :  { %2847 = vmatpush3.bf16.msra.mxu1 %v3019_v55 }
 0xa55   :  { %2848 = vmatprep.subr.bf16.mxu1 %v4300_v36  ;;  %v2522_v36 = vld [vmem:[%s4301_s4] ss:$0 sm:$0xff] }
 0xa58   :  { %2849 = vmatpush3.bf16.msra.mxu1 %v3020_v58 }
 0xb0e   :  { %v2089_v44 = vpop.f32.mrb[80].mxu1 }
 0xb0f   :  { %v2090_v7 = vadd.f32 %v2504_v4, %v2089_v44  ;;  %v2812_v12 = vpop.f32.mrb[81].mxu1 }
 0xb10   :  { %v2092_v53 = vpop.f32.mrb[82].mxu1 }
 0xb11   :  { %v4203_v15 = vadd.f32 %v2090_v7, %v3844_v9  ;;  %v2093_v18 = vadd.f32 %v2504_v4, %v2092_v53  ;;  %v2813_v54 = vpop.f32.mrb[83].mxu1 }
 0xb13   :  { %v4206_v51 = vadd.f32 %v2093_v18, %v3847_v10  ;;  %2098 = vadd.xlane.f32.xlu0 %v4203_v15 }
 0xb15   :  { %2100 = vadd.xlane.f32.xlu1 %v4206_v51 }
 0xba0   :  { %v2099_v9 = vpop.xlane.xlu0 %2098 }
 0xba1   :  { %v2103_v22 = vmul.f32 0.0078125, %v2099_v9 }
 0xba2   :  { %v2101_v10 = vpop.xlane.xlu1 %2100 }
 0xba3   :  { %v2105_v3 = vsub.f32 %v4203_v15, %v2103_v22  ;;  %v2104_v14 = vmul.f32 0.0078125, %v2101_v10 }
 0xba5   :  { %v2106_v16 = vsub.f32 %v4206_v51, %v2104_v14  ;;  %v2107_v17 = vmul.f32 %v2105_v3, %v2105_v3 }
 0xba7   :  { %2109 = vadd.xlane.f32.xlu0 %v2107_v17  ;;  %v2108_v60 = vmul.f32 %v2106_v16, %v2106_v16 }
 0xba9   :  { %2111 = vadd.xlane.f32.xlu1 %v2108_v60 }
 0xc34   :  { %v2110_v24 = vpop.xlane.xlu0 %2109 }
 0xc35   :  { %v2113_v28 = vmul.f32 0.007874016, %v2110_v24 }
 0xc36   :  { %v2112_v29 = vpop.xlane.xlu1 %2111 }
 0xc37   :  { %3041 = vrcp.f32 %v2113_v28  ;;  %v2114_v34 = vmul.f32 0.007874016, %v2112_v29 }
 0xc39   :  { %3043 = vrcp.f32 %v2114_v34 }
 0xc41   :  { %v3042_v49 = vpop.eup %3041 }
 0xc42   :  { %v2116_v41 = vmul.f32 %v3042_v49, %v2105_v3 }
 0xc43   :  { %v3044_v52 = vpop.eup %3043 }
 0xc44   :  { %v2118_v46 = vmul.f32 %v3044_v52, %v2106_v16 }
 0xc46   :  { %v2119_v42 = vpack.c.bf16 %v2118_v46, %v2116_v41 }
 0xc48   :  { %2831 = vmatmul.mubr.bf16.vlgmr.msra.gmra.mrb[64].mxu0 %v2119_v42 }
 0xd1b   :  { %v2225_v0 = vpop.f32.mrb[64].mxu0 }
 0xd1c   :  { %v2226_v13 = vadd.f32 %v2513_v47, %v2225_v0  ;;  %v2832_v32 = vpop.f32.mrb[65].mxu0 }
 0xd1d   :  { %v2228_v38 = vpop.f32.mrb[66].mxu0 }
 0xd1e   :  { %v2229_v48 = vadd.f32 %v2513_v47, %v2228_v38  ;;  %v2833_v1 = vpop.f32.mrb[67].mxu0  ;;  %v2232_v23 = vmax.f32 %v2226_v13, 0.0 }
 0xd20   :  { %v2233_v57 = vmax.f32 %v2229_v48, 0.0 }
 0xd22   :  { %v2234_v40 = vpack.c.bf16 %v2233_v57, %v2232_v23 }
 0xd24   :  { %2851 = vmatmul.mubr.bf16.vlgmr.msra.gmra.mrb[84].mxu1 %v2234_v40 }
 0xdf7   :  { %v2340_v61 = vpop.f32.mrb[84].mxu1 }
 0xdf8   :  { %v2341_v63 = vadd.f32 %v2522_v36, %v2340_v61  ;;  %v2852_v25 = vpop.f32.mrb[85].mxu1 }
 0xdf9   :  { %v2343_v56 = vpop.f32.mrb[86].mxu1 }
 0xdfa   :  { %v2347_v2 = vadd.f32 %v2341_v63, %v4203_v15  ;;  %v2344_v43 = vadd.f32 %v2522_v36, %v2343_v56  ;;  %v2853_v62 = vpop.f32.mrb[87].mxu1 }
 0xdfc   :  { %2349 = vst [vmem:[#allocation20] sm:$0xff] %v2347_v2  ;;  %v2348_v30 = vadd.f32 %v2344_v43, %v4206_v51 }
 0xdfe   :  { %2350 = vst [vmem:[#allocation20 + $0x8] sm:$0xff] %v2348_v30 }
 0xdff   :  { %3298 = shalt.err (!%p3295_p8)
}
 0xe00   :  { %s4302_s30 = sld [smem:[#allocation33_spill]] }
 0xe06   :  { %s3299_s8 = scalar_lea.hbm %s4302_s30, 256 }
 0xe07   :  { %p3300_p9 = scmp.ne.s32.totalorder %s4302_s30, %s3299_s8  ;;  %p3303_p10 = scmp.lt.u32.totalorder %s3299_s8, %s4302_s30 }
 0xe09   :  { %p3305_p11 = pnand %p3303_p10, %p3300_p9 }
 0xe0b   :  { %3308 = shalt.err (!%p3305_p11)
}
 0xe0c   :  { %2362 = dma.vmem_to_hbm [thread:$0]  %s2357_s16, 256, %s4302_s30, [#allocation4], %s3332_s21, %s3332_s21, %s3333_s3  }
 0xe0d   :  { %3321 = dma.done.wait [#allocation4], 256  }
 0xe0e   :  { %3322 = vsyncadd [#allocation4], 4294967040 }
 0xe0f   :  { %2366 = vsyncpa [#allocation3], 1 }
 0xe10   :  { %2367 = vsyncpa [#allocation6], 1 }
 0xe11   :  { %2368 = vsyncpa [#allocation9], 1 }
 0xe12   :  { %2369 = vsyncpa [#allocation12], 1 }
 0xe13   :  { %2370 = vsyncpa [#allocation15], 1 }
 0xe14   :  { %2371 = vsyncpa [#allocation18], 1 }
 0xe15   :  { %2372 = vsyncpa [#allocation4], 1 }

</bundles_post_ra>
